<compile_context>
chip_gen: v7x
topology: tpu7x:2x2x1
jax: 0.10.0
libtpu: 0.0.40
codegen_flags: <defaults>
</compile_context>

<pallas_src>
import math

import jax
import jax.numpy as jnp
from jax.experimental import pallas as pl
from jax.experimental.pallas import tpu as pltpu

# ---------------- config (small, BERT-like) ----------------
B = 2          # batch
S = 8          # sequence length
H = 32         # hidden size (stands in for 768)
NH = 4         # attention heads
DH = H // NH   # head dim
I = 64         # intermediate (FFN) size
V = 50         # vocab size
L = 2          # encoder layers
C = 2          # num classes (fc: H -> 2)
LN_EPS = 1e-12
F32 = jnp.float32


# ---------------- in-kernel helpers (pure VPU/EUP ops) ----------------
def _layernorm(x, g, b):
    mu = jnp.mean(x, axis=-1, keepdims=True)
    var = jnp.mean((x - mu) * (x - mu), axis=-1, keepdims=True)
    return (x - mu) * jax.lax.rsqrt(var + LN_EPS) * g + b


def _erf(x):
    # Abramowitz & Stegun 7.1.26 polynomial approximation, |abs err| < 1.5e-7.
    # Built from exp/mul/add/select only so it lowers on every TPU generation.
    a1, a2, a3, a4, a5 = 0.254829592, -0.284496736, 1.421413741, -1.453152027, 1.061405429
    p = 0.3275911
    z = jnp.abs(x)
    t = 1.0 / (1.0 + p * z)
    poly = ((((a5 * t + a4) * t + a3) * t + a2) * t + a1) * t
    e = 1.0 - poly * jnp.exp(-z * z)
    return jnp.where(x >= 0, e, -e)


def _gelu_exact(x):
    # Exact (erf-based) GELU, matching PyTorch/HF BERT's hidden activation.
    return 0.5 * x * (1.0 + _erf(x * (1.0 / math.sqrt(2.0))))


# ---------------- the single fused kernel (grid over layers) ----------------
def _bert_kernel(emb_ref, mask_ref, headv_ref, pool_w_ref, fc_w_ref,
                 wqkv_ref, wo_ref, wi_ref, wo2_ref, lvec_ref,
                 logits_ref, x_ref):
    """One grid step == one encoder layer; activation x_ref is a persistent VMEM scratch.

    emb:[B*S,H] mask:[B,S] headv:[4,H] pool_w:[H,H] fc_w:[H,C]
    per-layer (leading L squeezed by BlockSpec): wqkv:[H,3H] wo:[H,H] wi:[H,I] wo2:[I,H]
    lvec:[8,3H] packed (bqkv | bo | ln1_g | ln1_b | bi | bo2 | ln2_g | ln2_b).
    """
    l = pl.program_id(0)

    # --- first grid step: embedding LayerNorm into the resident activation ---
    @pl.when(l == 0)
    def _():
        x_ref[...] = _layernorm(emb_ref[...], headv_ref[0:1, :], headv_ref[1:2, :])

    x = x_ref[...]                                  # [B*S, H], f32
    vec = lvec_ref[...]                             # [8, 3H] packed small params
    bqkv = vec[0:1, :]                              # [1, 3H]
    bo = vec[1:2, 0:H]
    ln1g = vec[2:3, 0:H]
    ln1b = vec[3:4, 0:H]
    bi = vec[4:5, 0:I]
    bo2 = vec[5:6, 0:H]
    ln2g = vec[6:7, 0:H]
    ln2b = vec[7:8, 0:H]

    # --- fused QKV projection: one MXU pass [B*S,H] x [H,3H] ---
    qkv = jnp.dot(x, wqkv_ref[...], preferred_element_type=jnp.float32) + bqkv
    q3 = qkv[:, 0:H].reshape(B, S, H)
    k3 = qkv[:, H:2 * H].reshape(B, S, H)
    v3 = qkv[:, 2 * H:3 * H].reshape(B, S, H)

    # additive mask bias, broadcast hoisted out of the head loop (built once per layer)
    bias = mask_ref[...][:, None, :]                # [B, 1, S]
    scale = 1.0 / math.sqrt(DH)

    # --- multi-head attention, batched over B via einsum; NH unrolled at trace time ---
    # TODO(synk): a [B*NH, S, DH] fully-batched layout would cut this to 2 batched matmuls,
    # but requires an in-kernel 4D transpose; kept the compile-safe per-head einsum here.
    ctx_heads = []
    for h in range(NH):
        c0, c1 = h * DH, (h + 1) * DH
        qh = q3[:, :, c0:c1]                        # [B, S, DH]
        kh = k3[:, :, c0:c1]
        vh = v3[:, :, c0:c1]
        s = jnp.einsum('bqd,bkd->bqk', qh, kh,
                       preferred_element_type=jnp.float32) * scale + bias
        s = s - jnp.max(s, axis=-1, keepdims=True)
        p = jnp.exp(s)
        p = p / jnp.sum(p, axis=-1, keepdims=True)  # exact division (parity-safe)
        ctx_h = jnp.einsum('bqk,bkd->bqd', p, vh,
                           preferred_element_type=jnp.float32)          # [B, S, DH]
        ctx_heads.append(ctx_h.reshape(B * S, DH))
    ctx = jnp.concatenate(ctx_heads, axis=-1)       # [B*S, H]

    # --- single output projection + residual + LayerNorm 1 ---
    attn = jnp.dot(ctx, wo_ref[...], preferred_element_type=jnp.float32) + bo
    x1 = _layernorm(attn + x, ln1g, ln1b)

    # --- FFN: up-projection + exact GELU, down-projection + residual + LayerNorm 2 ---
    h_up = _gelu_exact(jnp.dot(x1, wi_ref[...], preferred_element_type=jnp.float32) + bi)
    h_dn = jnp.dot(h_up, wo2_ref[...], preferred_element_type=jnp.float32) + bo2
    x2 = _layernorm(h_dn + x1, ln2g, ln2b)
    x_ref[...] = x2                                 # carried to the next grid step in VMEM

    # --- last grid step: pooler(tanh) + dropout(identity, eval) + classifier ---
    @pl.when(l == pl.num_programs(0) - 1)
    def _():
        first_tok = x2.reshape(B, S, H)[:, 0, :]    # [B, H]
        pool_b = headv_ref[2:3, :]
        fc_b = headv_ref[3:4, 0:C]
        pooled = jnp.tanh(jnp.dot(first_tok, pool_w_ref[...],
                                  preferred_element_type=jnp.float32) + pool_b)
        # TODO(synk): dropout(p=0.2) is eval-mode identity; training-mode PRNG dropout not applied.
        logits_ref[...] = (jnp.dot(pooled, fc_w_ref[...],
                                   preferred_element_type=jnp.float32) + fc_b
                           ).astype(logits_ref.dtype)


# ---------------- wrapper: ONE pallas_call for the whole model ----------------
def bert_classify_forward(packed, input_ids, attention_mask):
    # embeddings: gather + add is glue (one XLA fusion feeding the kernel)
    we = jnp.take(packed["word_emb"], input_ids, axis=0)                  # [B,S,H]
    # TODO(synk): token_type_ids hard-coded to 0 (single-segment inputs).
    emb = (we + packed["pos_emb"][None, :, :]
           + packed["type_emb"][0][None, None, :]).reshape(B * S, H).astype(F32)
    mask_bias = (1.0 - attention_mask.astype(F32)) * -10000.0             # [B,S]

    return pl.pallas_call(
        _bert_kernel,
        out_shape=jax.ShapeDtypeStruct((B, C), F32),
        grid_spec=pltpu.PrefetchScalarGridSpec(
            num_scalar_prefetch=0,
            grid=(L,),
            in_specs=[
                pl.BlockSpec((B * S, H), lambda l: (0, 0)),          # emb (constant block)
                pl.BlockSpec((B, S), lambda l: (0, 0)),              # mask bias
                pl.BlockSpec((4, H), lambda l: (0, 0)),              # packed global vectors
                pl.BlockSpec((H, H), lambda l: (0, 0)),              # pooler weight
                pl.BlockSpec((H, C), lambda l: (0, 0)),              # classifier weight
                pl.BlockSpec((None, H, 3 * H), lambda l: (l, 0, 0)),  # wqkv[l]
                pl.BlockSpec((None, H, H), lambda l: (l, 0, 0)),      # wo[l]
                pl.BlockSpec((None, H, I), lambda l: (l, 0, 0)),      # wi[l]
                pl.BlockSpec((None, I, H), lambda l: (l, 0, 0)),      # wo2[l]
                pl.BlockSpec((None, 8, 3 * H), lambda l: (l, 0, 0)),  # packed layer vectors
            ],
            out_specs=pl.BlockSpec((B, C), lambda l: (0, 0)),        # resident, written at l==L-1
            scratch_shapes=[pltpu.VMEM((B * S, H), F32)],            # resident activation
        ),
        compiler_params=pltpu.CompilerParams(dimension_semantics=("arbitrary",)),
        # TODO(synk): at real BERT sizes (H=768, I=3072) cast matmul operands to bf16, tile the
        # FFN over I / the projections over N, add a "parallel" batch axis for v7x's 2 TCs, and
        # set vmem_limit_bytes explicitly for v7x's 64 MiB VMEM.
    )(emb, mask_bias, packed["head_vecs"], packed["pool_w"], packed["fc_w"],
      packed["wqkv"], packed["wo"], packed["wi"], packed["wo2"], packed["layer_vecs"])


# ---------------- parameter init + packing ----------------
def init_params(key):
    def nrm(k, shape):
        return jax.random.normal(k, shape, dtype=F32) * 0.02

    keys = jax.random.split(key, 5 + L * 4)
    ki = iter(keys)
    p = {
        "word_emb": nrm(next(ki), (V, H)),
        "pos_emb": nrm(next(ki), (S, H)),
        "type_emb": nrm(next(ki), (2, H)),
        "emb_ln_g": jnp.ones((H,), F32),
        "emb_ln_b": jnp.zeros((H,), F32),
        "pool_w": nrm(next(ki), (H, H)),
        "pool_b": jnp.zeros((H,), F32),
        "fc_w": nrm(next(ki), (H, C)),
        "fc_b": jnp.zeros((C,), F32),
        "layers": [],
    }
    for _ in range(L):
        p["layers"].append({
            "wqkv": nrm(next(ki), (H, 3 * H)), "bqkv": jnp.zeros((3 * H,), F32),
            "wo": nrm(next(ki), (H, H)), "bo": jnp.zeros((H,), F32),
            "ln1_g": jnp.ones((H,), F32), "ln1_b": jnp.zeros((H,), F32),
            "wi": nrm(next(ki), (H, I)), "bi": jnp.zeros((I,), F32),
            "wo2": nrm(next(ki), (I, H)), "bo2": jnp.zeros((H,), F32),
            "ln2_g": jnp.ones((H,), F32), "ln2_b": jnp.zeros((H,), F32),
        })
    return p


def pack_params(p):
    """Stack per-layer weights with a leading L dim and pack all tiny vectors into slabs."""
    head_vecs = jnp.zeros((4, H), F32)
    head_vecs = head_vecs.at[0].set(p["emb_ln_g"]).at[1].set(p["emb_ln_b"])
    head_vecs = head_vecs.at[2].set(p["pool_b"]).at[3, :C].set(p["fc_b"])

    lv = jnp.zeros((L, 8, 3 * H), F32)
    for i, lyr in enumerate(p["layers"]):
        lv = lv.at[i, 0, :].set(lyr["bqkv"])
        lv = lv.at[i, 1, :H].set(lyr["bo"])
        lv = lv.at[i, 2, :H].set(lyr["ln1_g"])
        lv = lv.at[i, 3, :H].set(lyr["ln1_b"])
        lv = lv.at[i, 4, :I].set(lyr["bi"])
        lv = lv.at[i, 5, :H].set(lyr["bo2"])
        lv = lv.at[i, 6, :H].set(lyr["ln2_g"])
        lv = lv.at[i, 7, :H].set(lyr["ln2_b"])

    return {
        "word_emb": p["word_emb"], "pos_emb": p["pos_emb"], "type_emb": p["type_emb"],
        "pool_w": p["pool_w"], "fc_w": p["fc_w"],
        "head_vecs": head_vecs, "layer_vecs": lv,
        "wqkv": jnp.stack([l["wqkv"] for l in p["layers"]]),
        "wo": jnp.stack([l["wo"] for l in p["layers"]]),
        "wi": jnp.stack([l["wi"] for l in p["layers"]]),
        "wo2": jnp.stack([l["wo2"] for l in p["layers"]]),
    }


# ---------------- pure-JAX reference (for numerical sanity) ----------------
def _ln_ref(x, g, b):
    mu = jnp.mean(x, axis=-1, keepdims=True)
    var = jnp.mean((x - mu) ** 2, axis=-1, keepdims=True)
    return (x - mu) * jax.lax.rsqrt(var + LN_EPS) * g + b


def bert_classify_reference(p, input_ids, attention_mask):
    from jax.scipy.special import erf
    we = jnp.take(p["word_emb"], input_ids, axis=0)
    x = we + p["pos_emb"][None] + p["type_emb"][0][None, None, :]
    x = _ln_ref(x, p["emb_ln_g"], p["emb_ln_b"])                           # [B,S,H]
    bias = (1.0 - attention_mask.astype(F32)) * -10000.0                   # [B,S]
    for lyr in p["layers"]:
        qkv = x @ lyr["wqkv"] + lyr["bqkv"]
        q, k, v = qkv[..., :H], qkv[..., H:2 * H], qkv[..., 2 * H:]
        q = q.reshape(B, S, NH, DH).transpose(0, 2, 1, 3)
        k = k.reshape(B, S, NH, DH).transpose(0, 2, 1, 3)
        v = v.reshape(B, S, NH, DH).transpose(0, 2, 1, 3)
        s = jnp.einsum('bhqd,bhkd->bhqk', q, k) / math.sqrt(DH) + bias[:, None, None, :]
        a = jax.nn.softmax(s, axis=-1)
        ctx = jnp.einsum('bhqk,bhkd->bhqd', a, v).transpose(0, 2, 1, 3).reshape(B, S, H)
        x1 = _ln_ref(ctx @ lyr["wo"] + lyr["bo"] + x, lyr["ln1_g"], lyr["ln1_b"])
        hu = x1 @ lyr["wi"] + lyr["bi"]
        hu = 0.5 * hu * (1.0 + erf(hu / math.sqrt(2.0)))
        x = _ln_ref(hu @ lyr["wo2"] + lyr["bo2"] + x1, lyr["ln2_g"], lyr["ln2_b"])
    pooled = jnp.tanh(x[:, 0, :] @ p["pool_w"] + p["pool_b"])
    return pooled @ p["fc_w"] + p["fc_b"]


if __name__ == "__main__":
    key = jax.random.PRNGKey(0)
    k_param, k_ids = jax.random.split(key)
    params = init_params(k_param)
    packed = pack_params(params)

    input_ids = jax.random.randint(k_ids, (B, S), 0, V, dtype=jnp.int32)
    attention_mask = jnp.array(
        [[1, 1, 1, 1, 1, 1, 1, 1],
         [1, 1, 1, 1, 1, 1, 0, 0]], dtype=jnp.int32)

    fwd = jax.jit(bert_classify_forward)
    logits = jax.block_until_ready(fwd(packed, input_ids, attention_mask))
    assert logits.shape == (B, C) and logits.dtype == jnp.float32

    ref = bert_classify_reference(params, input_ids, attention_mask)
    assert jnp.allclose(logits, ref, atol=1e-3, rtol=1e-3), (logits, ref)
    print("KERNEL_OK")
</pallas_src>

<mosaic_0001>
module attributes {stable_mosaic.version = 11 : i64} {
  func.func @_bert_kernel(%arg0: i32, %arg1: memref<16x32xf32, #tpu.memory_space<vmem>>, %arg2: memref<2x8xf32, #tpu.memory_space<vmem>>, %arg3: memref<4x32xf32, #tpu.memory_space<vmem>>, %arg4: memref<32x32xf32, #tpu.memory_space<vmem>>, %arg5: memref<32x2xf32, #tpu.memory_space<vmem>>, %arg6: memref<1x32x96xf32, #tpu.memory_space<vmem>>, %arg7: memref<1x32x32xf32, #tpu.memory_space<vmem>>, %arg8: memref<1x32x64xf32, #tpu.memory_space<vmem>>, %arg9: memref<1x64x32xf32, #tpu.memory_space<vmem>>, %arg10: memref<1x8x96xf32, #tpu.memory_space<vmem>>, %arg11: memref<2x2xf32, #tpu.memory_space<vmem>>, %arg12: memref<16x32xf32, #tpu.memory_space<vmem>>) attributes {dimension_semantics = [#tpu.dimension_semantics<arbitrary>], iteration_bounds = array<i64: 2>, scalar_prefetch = 0 : i64, scratch_operands = 1 : i64, tpu.core_type = #tpu.core_type<tc>, window_params = [{pipeline_mode = #tpu.pipeline_mode<synchronous>, transform_indices = @transform_0, window_bounds = array<i64: 16, 32>}, {pipeline_mode = #tpu.pipeline_mode<synchronous>, transform_indices = @transform_1, window_bounds = array<i64: 2, 8>}, {pipeline_mode = #tpu.pipeline_mode<synchronous>, transform_indices = @transform_2, window_bounds = array<i64: 4, 32>}, {pipeline_mode = #tpu.pipeline_mode<synchronous>, transform_indices = @transform_3, window_bounds = array<i64: 32, 32>}, {pipeline_mode = #tpu.pipeline_mode<synchronous>, transform_indices = @transform_4, window_bounds = array<i64: 32, 2>}, {transform_indices = @transform_5, window_bounds = array<i64: 1, 32, 96>}, {transform_indices = @transform_6, window_bounds = array<i64: 1, 32, 32>}, {transform_indices = @transform_7, window_bounds = array<i64: 1, 32, 64>}, {transform_indices = @transform_8, window_bounds = array<i64: 1, 64, 32>}, {transform_indices = @transform_9, window_bounds = array<i64: 1, 8, 96>}, {pipeline_mode = #tpu.pipeline_mode<synchronous>, transform_indices = @transform_10, window_bounds = array<i64: 2, 2>}]} {
    %c0_i32 = arith.constant 0 : i32
    %0 = arith.cmpi eq, %arg0, %c0_i32 : i32
    %1 = arith.extui %0 : i1 to i32
    %c0_i32_0 = arith.constant 0 : i32
    %2 = arith.cmpi ne, %1, %c0_i32_0 : i32
    scf.if %2 {
      %c0_70 = arith.constant 0 : index
      %c0_71 = arith.constant 0 : index
      %213 = vector.load %arg1[%c0_70, %c0_71] : memref<16x32xf32, #tpu.memory_space<vmem>>, vector<16x32xf32>
      %c0_72 = arith.constant 0 : index
      %c0_73 = arith.constant 0 : index
      %214 = vector.load %arg3[%c0_72, %c0_73] : memref<4x32xf32, #tpu.memory_space<vmem>>, vector<1x32xf32>
      %c1 = arith.constant 1 : index
      %c0_74 = arith.constant 0 : index
      %215 = vector.load %arg3[%c1, %c0_74] : memref<4x32xf32, #tpu.memory_space<vmem>>, vector<1x32xf32>
      %cst_75 = arith.constant dense<0.000000e+00> : vector<16xf32>
      %216 = vector.multi_reduction <add>, %213, %cst_75 [1] : vector<16x32xf32> to vector<16xf32>
      %217 = vector.shape_cast %216 : vector<16xf32> to vector<16x1xf32>
      %cst_76 = arith.constant 3.200000e+01 : f32
      %218 = vector.broadcast %cst_76 : f32 to vector<16x1xf32>
      %219 = arith.divf %217, %218 : vector<16x1xf32>
      %220 = vector.broadcast %219 : vector<16x1xf32> to vector<16x32xf32>
      %221 = arith.subf %213, %220 : vector<16x32xf32>
      %222 = vector.broadcast %219 : vector<16x1xf32> to vector<16x32xf32>
      %223 = arith.subf %213, %222 : vector<16x32xf32>
      %224 = arith.mulf %221, %223 : vector<16x32xf32>
      %cst_77 = arith.constant dense<0.000000e+00> : vector<16xf32>
      %225 = vector.multi_reduction <add>, %224, %cst_77 [1] : vector<16x32xf32> to vector<16xf32>
      %226 = vector.shape_cast %225 : vector<16xf32> to vector<16x1xf32>
      %cst_78 = arith.constant 3.200000e+01 : f32
      %227 = vector.broadcast %cst_78 : f32 to vector<16x1xf32>
      %228 = arith.divf %226, %227 : vector<16x1xf32>
      %229 = vector.broadcast %219 : vector<16x1xf32> to vector<16x32xf32>
      %230 = arith.subf %213, %229 : vector<16x32xf32>
      %cst_79 = arith.constant 9.99999996E-13 : f32
      %231 = vector.broadcast %cst_79 : f32 to vector<16x1xf32>
      %232 = arith.addf %228, %231 : vector<16x1xf32>
      %233 = math.rsqrt %232 : vector<16x1xf32>
      %234 = vector.broadcast %233 : vector<16x1xf32> to vector<16x32xf32>
      %235 = arith.mulf %230, %234 : vector<16x32xf32>
      %236 = vector.broadcast %214 : vector<1x32xf32> to vector<16x32xf32>
      %237 = arith.mulf %235, %236 : vector<16x32xf32>
      %238 = vector.broadcast %215 : vector<1x32xf32> to vector<16x32xf32>
      %239 = arith.addf %237, %238 : vector<16x32xf32>
      %c0_80 = arith.constant 0 : index
      %c0_81 = arith.constant 0 : index
      %240 = vector.load %arg12[%c0_80, %c0_81] : memref<16x32xf32, #tpu.memory_space<vmem>>, vector<16x32xf32>
      tpu.vector_store %arg12[%c0_80, %c0_81], %239 {strides = array<i32>} : memref<16x32xf32, #tpu.memory_space<vmem>>, vector<16x32xf32>,
    } else {
    }
    %c0 = arith.constant 0 : index
    %c0_1 = arith.constant 0 : index
    %3 = vector.load %arg12[%c0, %c0_1] : memref<16x32xf32, #tpu.memory_space<vmem>>, vector<16x32xf32>
    %c0_2 = arith.constant 0 : index
    %c0_3 = arith.constant 0 : index
    %c0_4 = arith.constant 0 : index
    %4 = vector.load %arg10[%c0_2, %c0_3, %c0_4] : memref<1x8x96xf32, #tpu.memory_space<vmem>>, vector<1x8x96xf32>
    %5 = vector.shape_cast %4 : vector<1x8x96xf32> to vector<8x96xf32>
    %6 = vector.extract_strided_slice %5 {offsets = [0, 0], sizes = [1, 96], strides = [1, 1]} : vector<8x96xf32> to vector<1x96xf32>
    %7 = vector.extract_strided_slice %5 {offsets = [1, 0], sizes = [1, 32], strides = [1, 1]} : vector<8x96xf32> to vector<1x32xf32>
    %8 = vector.extract_strided_slice %5 {offsets = [2, 0], sizes = [1, 32], strides = [1, 1]} : vector<8x96xf32> to vector<1x32xf32>
    %9 = vector.extract_strided_slice %5 {offsets = [3, 0], sizes = [1, 32], strides = [1, 1]} : vector<8x96xf32> to vector<1x32xf32>
    %10 = vector.extract_strided_slice %5 {offsets = [4, 0], sizes = [1, 64], strides = [1, 1]} : vector<8x96xf32> to vector<1x64xf32>
    %11 = vector.extract_strided_slice %5 {offsets = [5, 0], sizes = [1, 32], strides = [1, 1]} : vector<8x96xf32> to vector<1x32xf32>
    %12 = vector.extract_strided_slice %5 {offsets = [6, 0], sizes = [1, 32], strides = [1, 1]} : vector<8x96xf32> to vector<1x32xf32>
    %13 = vector.extract_strided_slice %5 {offsets = [7, 0], sizes = [1, 32], strides = [1, 1]} : vector<8x96xf32> to vector<1x32xf32>
    %c0_5 = arith.constant 0 : index
    %c0_6 = arith.constant 0 : index
    %c0_7 = arith.constant 0 : index
    %14 = vector.load %arg6[%c0_5, %c0_6, %c0_7] : memref<1x32x96xf32, #tpu.memory_space<vmem>>, vector<1x32x96xf32>
    %15 = vector.shape_cast %14 : vector<1x32x96xf32> to vector<32x96xf32>
    %cst = arith.constant dense<0.000000e+00> : vector<16x96xf32>
    %16 = tpu.matmul %3, %15, %cst {dimension_numbers = #tpu.dot_dimension_numbers<[1], [0], [0], [1], [0, 0, 1, 1], [], []>} : vector<16x32xf32>, vector<32x96xf32>, vector<16x96xf32> -> vector<16x96xf32>
    %17 = vector.broadcast %6 : vector<1x96xf32> to vector<16x96xf32>
    %18 = arith.addf %16, %17 : vector<16x96xf32>
    %19 = vector.extract_strided_slice %18 {offsets = [0, 0], sizes = [16, 32], strides = [1, 1]} : vector<16x96xf32> to vector<16x32xf32>
    %20 = vector.shape_cast %19 : vector<16x32xf32> to vector<2x8x32xf32>
    %21 = vector.extract_strided_slice %18 {offsets = [0, 32], sizes = [16, 32], strides = [1, 1]} : vector<16x96xf32> to vector<16x32xf32>
    %22 = vector.shape_cast %21 : vector<16x32xf32> to vector<2x8x32xf32>
    %23 = vector.extract_strided_slice %18 {offsets = [0, 64], sizes = [16, 32], strides = [1, 1]} : vector<16x96xf32> to vector<16x32xf32>
    %24 = vector.shape_cast %23 : vector<16x32xf32> to vector<2x8x32xf32>
    %c0_8 = arith.constant 0 : index
    %c0_9 = arith.constant 0 : index
    %25 = vector.load %arg2[%c0_8, %c0_9] : memref<2x8xf32, #tpu.memory_space<vmem>>, vector<2x8xf32>
    %26 = vector.shape_cast %25 : vector<2x8xf32> to vector<2x1x8xf32>
    %27 = vector.extract_strided_slice %20 {offsets = [0, 0, 0], sizes = [2, 8, 8], strides = [1, 1, 1]} : vector<2x8x32xf32> to vector<2x8x8xf32>
    %28 = vector.extract_strided_slice %22 {offsets = [0, 0, 0], sizes = [2, 8, 8], strides = [1, 1, 1]} : vector<2x8x32xf32> to vector<2x8x8xf32>
    %29 = vector.extract_strided_slice %24 {offsets = [0, 0, 0], sizes = [2, 8, 8], strides = [1, 1, 1]} : vector<2x8x32xf32> to vector<2x8x8xf32>
    "tpu.trace_start"() <{level = 10 : i32, message = "bqd,bkd->bqk"}> : () -> ()
    %cst_10 = arith.constant dense<0.000000e+00> : vector<2x8x8xf32>
    %30 = tpu.matmul %27, %28, %cst_10 {dimension_numbers = #tpu.dot_dimension_numbers<[2], [2], [1], [1], [0, 0, 0, 1, 1, 1], [0], [0]>} : vector<2x8x8xf32>, vector<2x8x8xf32>, vector<2x8x8xf32> -> vector<2x8x8xf32>
    "tpu.trace_stop"() : () -> ()
    %cst_11 = arith.constant 0.353553385 : f32
    %31 = vector.broadcast %cst_11 : f32 to vector<2x8x8xf32>
    %32 = arith.mulf %30, %31 : vector<2x8x8xf32>
    %33 = vector.broadcast %26 : vector<2x1x8xf32> to vector<2x8x8xf32>
    %34 = arith.addf %32, %33 : vector<2x8x8xf32>
    %cst_12 = arith.constant dense<0xFF800000> : vector<2x8xf32>
    %35 = vector.multi_reduction <maximumf>, %34, %cst_12 [2] : vector<2x8x8xf32> to vector<2x8xf32>
    %36 = vector.shape_cast %35 : vector<2x8xf32> to vector<2x8x1xf32>
    %37 = vector.broadcast %36 : vector<2x8x1xf32> to vector<2x8x8xf32>
    %38 = arith.subf %34, %37 : vector<2x8x8xf32>
    %39 = math.exp %38 : vector<2x8x8xf32>
    %cst_13 = arith.constant dense<0.000000e+00> : vector<2x8xf32>
    %40 = vector.multi_reduction <add>, %39, %cst_13 [2] : vector<2x8x8xf32> to vector<2x8xf32>
    %41 = vector.shape_cast %40 : vector<2x8xf32> to vector<2x8x1xf32>
    %42 = vector.broadcast %41 : vector<2x8x1xf32> to vector<2x8x8xf32>
    %43 = arith.divf %39, %42 : vector<2x8x8xf32>
    "tpu.trace_start"() <{level = 10 : i32, message = "bqk,bkd->bqd"}> : () -> ()
    %cst_14 = arith.constant dense<0.000000e+00> : vector<2x8x8xf32>
    %44 = tpu.matmul %43, %29, %cst_14 {dimension_numbers = #tpu.dot_dimension_numbers<[2], [1], [1], [2], [0, 0, 0, 1, 1, 2], [0], [0]>} : vector<2x8x8xf32>, vector<2x8x8xf32>, vector<2x8x8xf32> -> vector<2x8x8xf32>
    "tpu.trace_stop"() : () -> ()
    %45 = vector.shape_cast %44 : vector<2x8x8xf32> to vector<16x8xf32>
    %46 = vector.extract_strided_slice %20 {offsets = [0, 0, 8], sizes = [2, 8, 8], strides = [1, 1, 1]} : vector<2x8x32xf32> to vector<2x8x8xf32>
    %47 = vector.extract_strided_slice %22 {offsets = [0, 0, 8], sizes = [2, 8, 8], strides = [1, 1, 1]} : vector<2x8x32xf32> to vector<2x8x8xf32>
    %48 = vector.extract_strided_slice %24 {offsets = [0, 0, 8], sizes = [2, 8, 8], strides = [1, 1, 1]} : vector<2x8x32xf32> to vector<2x8x8xf32>
    "tpu.trace_start"() <{level = 10 : i32, message = "bqd,bkd->bqk"}> : () -> ()
    %cst_15 = arith.constant dense<0.000000e+00> : vector<2x8x8xf32>
    %49 = tpu.matmul %46, %47, %cst_15 {dimension_numbers = #tpu.dot_dimension_numbers<[2], [2], [1], [1], [0, 0, 0, 1, 1, 1], [0], [0]>} : vector<2x8x8xf32>, vector<2x8x8xf32>, vector<2x8x8xf32> -> vector<2x8x8xf32>
    "tpu.trace_stop"() : () -> ()
    %cst_16 = arith.constant 0.353553385 : f32
    %50 = vector.broadcast %cst_16 : f32 to vector<2x8x8xf32>
    %51 = arith.mulf %49, %50 : vector<2x8x8xf32>
    %52 = vector.broadcast %26 : vector<2x1x8xf32> to vector<2x8x8xf32>
    %53 = arith.addf %51, %52 : vector<2x8x8xf32>
    %cst_17 = arith.constant dense<0xFF800000> : vector<2x8xf32>
    %54 = vector.multi_reduction <maximumf>, %53, %cst_17 [2] : vector<2x8x8xf32> to vector<2x8xf32>
    %55 = vector.shape_cast %54 : vector<2x8xf32> to vector<2x8x1xf32>
    %56 = vector.broadcast %55 : vector<2x8x1xf32> to vector<2x8x8xf32>
    %57 = arith.subf %53, %56 : vector<2x8x8xf32>
    %58 = math.exp %57 : vector<2x8x8xf32>
    %cst_18 = arith.constant dense<0.000000e+00> : vector<2x8xf32>
    %59 = vector.multi_reduction <add>, %58, %cst_18 [2] : vector<2x8x8xf32> to vector<2x8xf32>
    %60 = vector.shape_cast %59 : vector<2x8xf32> to vector<2x8x1xf32>
    %61 = vector.broadcast %60 : vector<2x8x1xf32> to vector<2x8x8xf32>
    %62 = arith.divf %58, %61 : vector<2x8x8xf32>
    "tpu.trace_start"() <{level = 10 : i32, message = "bqk,bkd->bqd"}> : () -> ()
    %cst_19 = arith.constant dense<0.000000e+00> : vector<2x8x8xf32>
    %63 = tpu.matmul %62, %48, %cst_19 {dimension_numbers = #tpu.dot_dimension_numbers<[2], [1], [1], [2], [0, 0, 0, 1, 1, 2], [0], [0]>} : vector<2x8x8xf32>, vector<2x8x8xf32>, vector<2x8x8xf32> -> vector<2x8x8xf32>
    "tpu.trace_stop"() : () -> ()
    %64 = vector.shape_cast %63 : vector<2x8x8xf32> to vector<16x8xf32>
    %65 = vector.extract_strided_slice %20 {offsets = [0, 0, 16], sizes = [2, 8, 8], strides = [1, 1, 1]} : vector<2x8x32xf32> to vector<2x8x8xf32>
    %66 = vector.extract_strided_slice %22 {offsets = [0, 0, 16], sizes = [2, 8, 8], strides = [1, 1, 1]} : vector<2x8x32xf32> to vector<2x8x8xf32>
    %67 = vector.extract_strided_slice %24 {offsets = [0, 0, 16], sizes = [2, 8, 8], strides = [1, 1, 1]} : vector<2x8x32xf32> to vector<2x8x8xf32>
    "tpu.trace_start"() <{level = 10 : i32, message = "bqd,bkd->bqk"}> : () -> ()
    %cst_20 = arith.constant dense<0.000000e+00> : vector<2x8x8xf32>
    %68 = tpu.matmul %65, %66, %cst_20 {dimension_numbers = #tpu.dot_dimension_numbers<[2], [2], [1], [1], [0, 0, 0, 1, 1, 1], [0], [0]>} : vector<2x8x8xf32>, vector<2x8x8xf32>, vector<2x8x8xf32> -> vector<2x8x8xf32>
    "tpu.trace_stop"() : () -> ()
    %cst_21 = arith.constant 0.353553385 : f32
    %69 = vector.broadcast %cst_21 : f32 to vector<2x8x8xf32>
    %70 = arith.mulf %68, %69 : vector<2x8x8xf32>
    %71 = vector.broadcast %26 : vector<2x1x8xf32> to vector<2x8x8xf32>
    %72 = arith.addf %70, %71 : vector<2x8x8xf32>
    %cst_22 = arith.constant dense<0xFF800000> : vector<2x8xf32>
    %73 = vector.multi_reduction <maximumf>, %72, %cst_22 [2] : vector<2x8x8xf32> to vector<2x8xf32>
    %74 = vector.shape_cast %73 : vector<2x8xf32> to vector<2x8x1xf32>
    %75 = vector.broadcast %74 : vector<2x8x1xf32> to vector<2x8x8xf32>
    %76 = arith.subf %72, %75 : vector<2x8x8xf32>
    %77 = math.exp %76 : vector<2x8x8xf32>
    %cst_23 = arith.constant dense<0.000000e+00> : vector<2x8xf32>
    %78 = vector.multi_reduction <add>, %77, %cst_23 [2] : vector<2x8x8xf32> to vector<2x8xf32>
    %79 = vector.shape_cast %78 : vector<2x8xf32> to vector<2x8x1xf32>
    %80 = vector.broadcast %79 : vector<2x8x1xf32> to vector<2x8x8xf32>
    %81 = arith.divf %77, %80 : vector<2x8x8xf32>
    "tpu.trace_start"() <{level = 10 : i32, message = "bqk,bkd->bqd"}> : () -> ()
    %cst_24 = arith.constant dense<0.000000e+00> : vector<2x8x8xf32>
    %82 = tpu.matmul %81, %67, %cst_24 {dimension_numbers = #tpu.dot_dimension_numbers<[2], [1], [1], [2], [0, 0, 0, 1, 1, 2], [0], [0]>} : vector<2x8x8xf32>, vector<2x8x8xf32>, vector<2x8x8xf32> -> vector<2x8x8xf32>
    "tpu.trace_stop"() : () -> ()
    %83 = vector.shape_cast %82 : vector<2x8x8xf32> to vector<16x8xf32>
    %84 = vector.extract_strided_slice %20 {offsets = [0, 0, 24], sizes = [2, 8, 8], strides = [1, 1, 1]} : vector<2x8x32xf32> to vector<2x8x8xf32>
    %85 = vector.extract_strided_slice %22 {offsets = [0, 0, 24], sizes = [2, 8, 8], strides = [1, 1, 1]} : vector<2x8x32xf32> to vector<2x8x8xf32>
    %86 = vector.extract_strided_slice %24 {offsets = [0, 0, 24], sizes = [2, 8, 8], strides = [1, 1, 1]} : vector<2x8x32xf32> to vector<2x8x8xf32>
    "tpu.trace_start"() <{level = 10 : i32, message = "bqd,bkd->bqk"}> : () -> ()
    %cst_25 = arith.constant dense<0.000000e+00> : vector<2x8x8xf32>
    %87 = tpu.matmul %84, %85, %cst_25 {dimension_numbers = #tpu.dot_dimension_numbers<[2], [2], [1], [1], [0, 0, 0, 1, 1, 1], [0], [0]>} : vector<2x8x8xf32>, vector<2x8x8xf32>, vector<2x8x8xf32> -> vector<2x8x8xf32>
    "tpu.trace_stop"() : () -> ()
    %cst_26 = arith.constant 0.353553385 : f32
    %88 = vector.broadcast %cst_26 : f32 to vector<2x8x8xf32>
    %89 = arith.mulf %87, %88 : vector<2x8x8xf32>
    %90 = vector.broadcast %26 : vector<2x1x8xf32> to vector<2x8x8xf32>
    %91 = arith.addf %89, %90 : vector<2x8x8xf32>
    %cst_27 = arith.constant dense<0xFF800000> : vector<2x8xf32>
    %92 = vector.multi_reduction <maximumf>, %91, %cst_27 [2] : vector<2x8x8xf32> to vector<2x8xf32>
    %93 = vector.shape_cast %92 : vector<2x8xf32> to vector<2x8x1xf32>
    %94 = vector.broadcast %93 : vector<2x8x1xf32> to vector<2x8x8xf32>
    %95 = arith.subf %91, %94 : vector<2x8x8xf32>
    %96 = math.exp %95 : vector<2x8x8xf32>
    %cst_28 = arith.constant dense<0.000000e+00> : vector<2x8xf32>
    %97 = vector.multi_reduction <add>, %96, %cst_28 [2] : vector<2x8x8xf32> to vector<2x8xf32>
    %98 = vector.shape_cast %97 : vector<2x8xf32> to vector<2x8x1xf32>
    %99 = vector.broadcast %98 : vector<2x8x1xf32> to vector<2x8x8xf32>
    %100 = arith.divf %96, %99 : vector<2x8x8xf32>
    "tpu.trace_start"() <{level = 10 : i32, message = "bqk,bkd->bqd"}> : () -> ()
    %cst_29 = arith.constant dense<0.000000e+00> : vector<2x8x8xf32>
    %101 = tpu.matmul %100, %86, %cst_29 {dimension_numbers = #tpu.dot_dimension_numbers<[2], [1], [1], [2], [0, 0, 0, 1, 1, 2], [0], [0]>} : vector<2x8x8xf32>, vector<2x8x8xf32>, vector<2x8x8xf32> -> vector<2x8x8xf32>
    "tpu.trace_stop"() : () -> ()
    %102 = vector.shape_cast %101 : vector<2x8x8xf32> to vector<16x8xf32>
    %103 = tpu.concatenate %45, %64, %83, %102 in 1 : vector<16x8xf32>, vector<16x8xf32>, vector<16x8xf32>, vector<16x8xf32> -> vector<16x32xf32>
    %c0_30 = arith.constant 0 : index
    %c0_31 = arith.constant 0 : index
    %c0_32 = arith.constant 0 : index
    %104 = vector.load %arg7[%c0_30, %c0_31, %c0_32] : memref<1x32x32xf32, #tpu.memory_space<vmem>>, vector<1x32x32xf32>
    %105 = vector.shape_cast %104 : vector<1x32x32xf32> to vector<32x32xf32>
    %cst_33 = arith.constant dense<0.000000e+00> : vector<16x32xf32>
    %106 = tpu.matmul %103, %105, %cst_33 {dimension_numbers = #tpu.dot_dimension_numbers<[1], [0], [0], [1], [0, 0, 1, 1], [], []>} : vector<16x32xf32>, vector<32x32xf32>, vector<16x32xf32> -> vector<16x32xf32>
    %107 = vector.broadcast %7 : vector<1x32xf32> to vector<16x32xf32>
    %108 = arith.addf %106, %107 : vector<16x32xf32>
    %109 = arith.addf %108, %3 : vector<16x32xf32>
    %cst_34 = arith.constant dense<0.000000e+00> : vector<16xf32>
    %110 = vector.multi_reduction <add>, %109, %cst_34 [1] : vector<16x32xf32> to vector<16xf32>
    %111 = vector.shape_cast %110 : vector<16xf32> to vector<16x1xf32>
    %cst_35 = arith.constant 3.200000e+01 : f32
    %112 = vector.broadcast %cst_35 : f32 to vector<16x1xf32>
    %113 = arith.divf %111, %112 : vector<16x1xf32>
    %114 = vector.broadcast %113 : vector<16x1xf32> to vector<16x32xf32>
    %115 = arith.subf %109, %114 : vector<16x32xf32>
    %116 = vector.broadcast %113 : vector<16x1xf32> to vector<16x32xf32>
    %117 = arith.subf %109, %116 : vector<16x32xf32>
    %118 = arith.mulf %115, %117 : vector<16x32xf32>
    %cst_36 = arith.constant dense<0.000000e+00> : vector<16xf32>
    %119 = vector.multi_reduction <add>, %118, %cst_36 [1] : vector<16x32xf32> to vector<16xf32>
    %120 = vector.shape_cast %119 : vector<16xf32> to vector<16x1xf32>
    %cst_37 = arith.constant 3.200000e+01 : f32
    %121 = vector.broadcast %cst_37 : f32 to vector<16x1xf32>
    %122 = arith.divf %120, %121 : vector<16x1xf32>
    %123 = vector.broadcast %113 : vector<16x1xf32> to vector<16x32xf32>
    %124 = arith.subf %109, %123 : vector<16x32xf32>
    %cst_38 = arith.constant 9.99999996E-13 : f32
    %125 = vector.broadcast %cst_38 : f32 to vector<16x1xf32>
    %126 = arith.addf %122, %125 : vector<16x1xf32>
    %127 = math.rsqrt %126 : vector<16x1xf32>
    %128 = vector.broadcast %127 : vector<16x1xf32> to vector<16x32xf32>
    %129 = arith.mulf %124, %128 : vector<16x32xf32>
    %130 = vector.broadcast %8 : vector<1x32xf32> to vector<16x32xf32>
    %131 = arith.mulf %129, %130 : vector<16x32xf32>
    %132 = vector.broadcast %9 : vector<1x32xf32> to vector<16x32xf32>
    %133 = arith.addf %131, %132 : vector<16x32xf32>
    %c0_39 = arith.constant 0 : index
    %c0_40 = arith.constant 0 : index
    %c0_41 = arith.constant 0 : index
    %134 = vector.load %arg8[%c0_39, %c0_40, %c0_41] : memref<1x32x64xf32, #tpu.memory_space<vmem>>, vector<1x32x64xf32>
    %135 = vector.shape_cast %134 : vector<1x32x64xf32> to vector<32x64xf32>
    %cst_42 = arith.constant dense<0.000000e+00> : vector<16x64xf32>
    %136 = tpu.matmul %133, %135, %cst_42 {dimension_numbers = #tpu.dot_dimension_numbers<[1], [0], [0], [1], [0, 0, 1, 1], [], []>} : vector<16x32xf32>, vector<32x64xf32>, vector<16x64xf32> -> vector<16x64xf32>
    %137 = vector.broadcast %10 : vector<1x64xf32> to vector<16x64xf32>
    %138 = arith.addf %136, %137 : vector<16x64xf32>
    %cst_43 = arith.constant 5.000000e-01 : f32
    %139 = vector.broadcast %cst_43 : f32 to vector<16x64xf32>
    %140 = arith.mulf %139, %138 : vector<16x64xf32>
    %cst_44 = arith.constant 0.707106769 : f32
    %141 = vector.broadcast %cst_44 : f32 to vector<16x64xf32>
    %142 = arith.mulf %138, %141 : vector<16x64xf32>
    %143 = math.absf %142 : vector<16x64xf32>
    %cst_45 = arith.constant 0.327591091 : f32
    %144 = vector.broadcast %cst_45 : f32 to vector<16x64xf32>
    %145 = arith.mulf %144, %143 : vector<16x64xf32>
    %cst_46 = arith.constant 1.000000e+00 : f32
    %146 = vector.broadcast %cst_46 : f32 to vector<16x64xf32>
    %147 = arith.addf %146, %145 : vector<16x64xf32>
    %cst_47 = arith.constant 1.000000e+00 : f32
    %148 = vector.broadcast %cst_47 : f32 to vector<16x64xf32>
    %149 = arith.divf %148, %147 : vector<16x64xf32>
    %cst_48 = arith.constant 1.06140542 : f32
    %150 = vector.broadcast %cst_48 : f32 to vector<16x64xf32>
    %151 = arith.mulf %150, %149 : vector<16x64xf32>
    %cst_49 = arith.constant -1.45315206 : f32
    %152 = vector.broadcast %cst_49 : f32 to vector<16x64xf32>
    %153 = arith.addf %151, %152 : vector<16x64xf32>
    %154 = arith.mulf %153, %149 : vector<16x64xf32>
    %cst_50 = arith.constant 1.42141378 : f32
    %155 = vector.broadcast %cst_50 : f32 to vector<16x64xf32>
    %156 = arith.addf %154, %155 : vector<16x64xf32>
    %157 = arith.mulf %156, %149 : vector<16x64xf32>
    %cst_51 = arith.constant -0.284496725 : f32
    %158 = vector.broadcast %cst_51 : f32 to vector<16x64xf32>
    %159 = arith.addf %157, %158 : vector<16x64xf32>
    %160 = arith.mulf %159, %149 : vector<16x64xf32>
    %cst_52 = arith.constant 0.254829586 : f32
    %161 = vector.broadcast %cst_52 : f32 to vector<16x64xf32>
    %162 = arith.addf %160, %161 : vector<16x64xf32>
    %163 = arith.mulf %162, %149 : vector<16x64xf32>
    %cst_53 = arith.constant 0.000000e+00 : f32
    %164 = vector.broadcast %cst_53 : f32 to vector<16x64xf32>
    %165 = arith.subf %164, %143 : vector<16x64xf32>
    %166 = arith.mulf %165, %143 : vector<16x64xf32>
    %167 = math.exp %166 : vector<16x64xf32>
    %168 = arith.mulf %163, %167 : vector<16x64xf32>
    %cst_54 = arith.constant 1.000000e+00 : f32
    %169 = vector.broadcast %cst_54 : f32 to vector<16x64xf32>
    %170 = arith.subf %169, %168 : vector<16x64xf32>
    %cst_55 = arith.constant 0.000000e+00 : f32
    %171 = vector.broadcast %cst_55 : f32 to vector<16x64xf32>
    %172 = arith.cmpf oge, %142, %171 : vector<16x64xf32>
    %cst_56 = arith.constant 0.000000e+00 : f32
    %173 = vector.broadcast %cst_56 : f32 to vector<16x64xf32>
    %174 = arith.subf %173, %170 : vector<16x64xf32>
    %175 = arith.select %172, %170, %174 : vector<16x64xi1>, vector<16x64xf32>
    %cst_57 = arith.constant 1.000000e+00 : f32
    %176 = vector.broadcast %cst_57 : f32 to vector<16x64xf32>
    %177 = arith.addf %176, %175 : vector<16x64xf32>
    %178 = arith.mulf %140, %177 : vector<16x64xf32>
    %c0_58 = arith.constant 0 : index
    %c0_59 = arith.constant 0 : index
    %c0_60 = arith.constant 0 : index
    %179 = vector.load %arg9[%c0_58, %c0_59, %c0_60] : memref<1x64x32xf32, #tpu.memory_space<vmem>>, vector<1x64x32xf32>
    %180 = vector.shape_cast %179 : vector<1x64x32xf32> to vector<64x32xf32>
    %cst_61 = arith.constant dense<0.000000e+00> : vector<16x32xf32>
    %181 = tpu.matmul %178, %180, %cst_61 {dimension_numbers = #tpu.dot_dimension_numbers<[1], [0], [0], [1], [0, 0, 1, 1], [], []>} : vector<16x64xf32>, vector<64x32xf32>, vector<16x32xf32> -> vector<16x32xf32>
    %182 = vector.broadcast %11 : vector<1x32xf32> to vector<16x32xf32>
    %183 = arith.addf %181, %182 : vector<16x32xf32>
    %184 = arith.addf %183, %133 : vector<16x32xf32>
    %cst_62 = arith.constant dense<0.000000e+00> : vector<16xf32>
    %185 = vector.multi_reduction <add>, %184, %cst_62 [1] : vector<16x32xf32> to vector<16xf32>
    %186 = vector.shape_cast %185 : vector<16xf32> to vector<16x1xf32>
    %cst_63 = arith.constant 3.200000e+01 : f32
    %187 = vector.broadcast %cst_63 : f32 to vector<16x1xf32>
    %188 = arith.divf %186, %187 : vector<16x1xf32>
    %189 = vector.broadcast %188 : vector<16x1xf32> to vector<16x32xf32>
    %190 = arith.subf %184, %189 : vector<16x32xf32>
    %191 = vector.broadcast %188 : vector<16x1xf32> to vector<16x32xf32>
    %192 = arith.subf %184, %191 : vector<16x32xf32>
    %193 = arith.mulf %190, %192 : vector<16x32xf32>
    %cst_64 = arith.constant dense<0.000000e+00> : vector<16xf32>
    %194 = vector.multi_reduction <add>, %193, %cst_64 [1] : vector<16x32xf32> to vector<16xf32>
    %195 = vector.shape_cast %194 : vector<16xf32> to vector<16x1xf32>
    %cst_65 = arith.constant 3.200000e+01 : f32
    %196 = vector.broadcast %cst_65 : f32 to vector<16x1xf32>
    %197 = arith.divf %195, %196 : vector<16x1xf32>
    %198 = vector.broadcast %188 : vector<16x1xf32> to vector<16x32xf32>
    %199 = arith.subf %184, %198 : vector<16x32xf32>
    %cst_66 = arith.constant 9.99999996E-13 : f32
    %200 = vector.broadcast %cst_66 : f32 to vector<16x1xf32>
    %201 = arith.addf %197, %200 : vector<16x1xf32>
    %202 = math.rsqrt %201 : vector<16x1xf32>
    %203 = vector.broadcast %202 : vector<16x1xf32> to vector<16x32xf32>
    %204 = arith.mulf %199, %203 : vector<16x32xf32>
    %205 = vector.broadcast %12 : vector<1x32xf32> to vector<16x32xf32>
    %206 = arith.mulf %204, %205 : vector<16x32xf32>
    %207 = vector.broadcast %13 : vector<1x32xf32> to vector<16x32xf32>
    %208 = arith.addf %206, %207 : vector<16x32xf32>
    %c0_67 = arith.constant 0 : index
    %c0_68 = arith.constant 0 : index
    %209 = vector.load %arg12[%c0_67, %c0_68] : memref<16x32xf32, #tpu.memory_space<vmem>>, vector<16x32xf32>
    tpu.vector_store %arg12[%c0_67, %c0_68], %208 {strides = array<i32>} : memref<16x32xf32, #tpu.memory_space<vmem>>, vector<16x32xf32>,
    %c1_i32 = arith.constant 1 : i32
    %210 = arith.cmpi eq, %arg0, %c1_i32 : i32
    %211 = arith.extui %210 : i1 to i32
    %c0_i32_69 = arith.constant 0 : i32
    %212 = arith.cmpi ne, %211, %c0_i32_69 : i32
    scf.if %212 {
      %213 = vector.shape_cast %208 : vector<16x32xf32> to vector<2x8x32xf32>
      %214 = vector.extract_strided_slice %213 {offsets = [0, 0, 0], sizes = [2, 1, 32], strides = [1, 1, 1]} : vector<2x8x32xf32> to vector<2x1x32xf32>
      %215 = vector.shape_cast %214 : vector<2x1x32xf32> to vector<2x32xf32>
      %c2 = arith.constant 2 : index
      %c0_70 = arith.constant 0 : index
      %216 = vector.load %arg3[%c2, %c0_70] : memref<4x32xf32, #tpu.memory_space<vmem>>, vector<1x32xf32>
      %c3 = arith.constant 3 : index
      %c0_71 = arith.constant 0 : index
      %217 = vector.load %arg3[%c3, %c0_71] : memref<4x32xf32, #tpu.memory_space<vmem>>, vector<1x2xf32>
      %c0_72 = arith.constant 0 : index
      %c0_73 = arith.constant 0 : index
      %218 = vector.load %arg4[%c0_72, %c0_73] : memref<32x32xf32, #tpu.memory_space<vmem>>, vector<32x32xf32>
      %cst_74 = arith.constant dense<0.000000e+00> : vector<2x32xf32>
      %219 = tpu.matmul %215, %218, %cst_74 {dimension_numbers = #tpu.dot_dimension_numbers<[1], [0], [0], [1], [0, 0, 1, 1], [], []>} : vector<2x32xf32>, vector<32x32xf32>, vector<2x32xf32> -> vector<2x32xf32>
      %220 = vector.broadcast %216 : vector<1x32xf32> to vector<2x32xf32>
      %221 = arith.addf %219, %220 : vector<2x32xf32>
      %222 = math.tanh %221 : vector<2x32xf32>
      %c0_75 = arith.constant 0 : index
      %c0_76 = arith.constant 0 : index
      %223 = vector.load %arg5[%c0_75, %c0_76] : memref<32x2xf32, #tpu.memory_space<vmem>>, vector<32x2xf32>
      %cst_77 = arith.constant dense<0.000000e+00> : vector<2x2xf32>
      %224 = tpu.matmul %222, %223, %cst_77 {dimension_numbers = #tpu.dot_dimension_numbers<[1], [0], [0], [1], [0, 0, 1, 1], [], []>} : vector<2x32xf32>, vector<32x2xf32>, vector<2x2xf32> -> vector<2x2xf32>
      %225 = vector.broadcast %217 : vector<1x2xf32> to vector<2x2xf32>
      %226 = arith.addf %224, %225 : vector<2x2xf32>
      %c0_78 = arith.constant 0 : index
      %c0_79 = arith.constant 0 : index
      %227 = vector.load %arg11[%c0_78, %c0_79] : memref<2x2xf32, #tpu.memory_space<vmem>>, vector<2x2xf32>
      tpu.vector_store %arg11[%c0_78, %c0_79], %226 {strides = array<i32>} : memref<2x2xf32, #tpu.memory_space<vmem>>, vector<2x2xf32>,
    } else {
    }
    return
  }
  func.func @transform_0(%arg0: i32) -> (i32, i32) {
    %c0_i32 = arith.constant 0 : i32
    %c0_i32_0 = arith.constant 0 : i32
    %c0_i32_1 = arith.constant 0 : i32
    return %c0_i32, %c0_i32_0 : i32, i32
  }
  func.func @transform_1(%arg0: i32) -> (i32, i32) {
    %c0_i32 = arith.constant 0 : i32
    %c0_i32_0 = arith.constant 0 : i32
    %c0_i32_1 = arith.constant 0 : i32
    return %c0_i32, %c0_i32_0 : i32, i32
  }
  func.func @transform_2(%arg0: i32) -> (i32, i32) {
    %c0_i32 = arith.constant 0 : i32
    %c0_i32_0 = arith.constant 0 : i32
    %c0_i32_1 = arith.constant 0 : i32
    return %c0_i32, %c0_i32_0 : i32, i32
  }
  func.func @transform_3(%arg0: i32) -> (i32, i32) {
    %c0_i32 = arith.constant 0 : i32
    %c0_i32_0 = arith.constant 0 : i32
    %c0_i32_1 = arith.constant 0 : i32
    return %c0_i32, %c0_i32_0 : i32, i32
  }
  func.func @transform_4(%arg0: i32) -> (i32, i32) {
    %c0_i32 = arith.constant 0 : i32
    %c0_i32_0 = arith.constant 0 : i32
    %c0_i32_1 = arith.constant 0 : i32
    return %c0_i32, %c0_i32_0 : i32, i32
  }
  func.func @transform_5(%arg0: i32) -> (i32, i32, i32) {
    %c0_i32 = arith.constant 0 : i32
    %c0_i32_0 = arith.constant 0 : i32
    %c0_i32_1 = arith.constant 0 : i32
    return %arg0, %c0_i32, %c0_i32_0 : i32, i32, i32
  }
  func.func @transform_6(%arg0: i32) -> (i32, i32, i32) {
    %c0_i32 = arith.constant 0 : i32
    %c0_i32_0 = arith.constant 0 : i32
    %c0_i32_1 = arith.constant 0 : i32
    return %arg0, %c0_i32, %c0_i32_0 : i32, i32, i32
  }
  func.func @transform_7(%arg0: i32) -> (i32, i32, i32) {
    %c0_i32 = arith.constant 0 : i32
    %c0_i32_0 = arith.constant 0 : i32
    %c0_i32_1 = arith.constant 0 : i32
    return %arg0, %c0_i32, %c0_i32_0 : i32, i32, i32
  }
  func.func @transform_8(%arg0: i32) -> (i32, i32, i32) {
    %c0_i32 = arith.constant 0 : i32
    %c0_i32_0 = arith.constant 0 : i32
    %c0_i32_1 = arith.constant 0 : i32
    return %arg0, %c0_i32, %c0_i32_0 : i32, i32, i32
  }
  func.func @transform_9(%arg0: i32) -> (i32, i32, i32) {
    %c0_i32 = arith.constant 0 : i32
    %c0_i32_0 = arith.constant 0 : i32
    %c0_i32_1 = arith.constant 0 : i32
    return %arg0, %c0_i32, %c0_i32_0 : i32, i32, i32
  }
  func.func @transform_10(%arg0: i32) -> (i32, i32) {
    %c0_i32 = arith.constant 0 : i32
    %c0_i32_0 = arith.constant 0 : i32
    %c0_i32_1 = arith.constant 0 : i32
    return %c0_i32, %c0_i32_0 : i32, i32
  }
}

</mosaic_0001>

<bundles_post_ra>
// kernel: bert_classify_forward.1
= control target key start
LH: loop header
LB: loop body
LE: loop exit
PB: predicated region body
PF: predicated region fallthrough
CT: control target
= control target key end

     0   :  { %15 = vsyncpa [#allocation4], 0  ;;  %s3186_s13 = smov 0   ;;  %s3520_s0 = inlined_call_operand.vmem [shape: f32[16,32], index: 0, kind: input, shape index: {}]   ;;  %s3521_s1 = inlined_call_operand.vmem [shape: f32[2,8], index: 1, kind: input, shape index: {}]   ;;  %s3522_s2 = inlined_call_operand.vmem [shape: f32[4,32], index: 2, kind: input, shape index: {}]   ;;  %s3523_s3 = inlined_call_operand.vmem [shape: f32[32,32], index: 3, kind: input, shape index: {}]   ;;  %s3524_s4 = inlined_call_operand.vmem [shape: f32[32,2], index: 4, kind: input, shape index: {}]   ;;  %s3525_s5 = inlined_call_operand.vmem [shape: f32[2,32,96], index: 5, kind: input, shape index: {}]   ;;  %s3526_s6 = inlined_call_operand.vmem [shape: f32[2,32,32], index: 6, kind: input, shape index: {}]   ;;  %s3527_s7 = inlined_call_operand.vmem [shape: f32[2,32,64], index: 7, kind: input, shape index: {}]   ;;  %s3528_s8 = inlined_call_operand.vmem [shape: f32[2,64,32], index: 8, kind: input, shape index: {}]   ;;  %s3529_s9 = inlined_call_operand.vmem [shape: f32[2,8,96], index: 9, kind: input, shape index: {}]   ;;  %s3530_s10 = inlined_call_operand.hbm [shape: f32[2,2], index: 10, kind: output, shape index: {}]  }
   0x1 LB: > { %s3192_s14 = sadd.s32 4294967295, %s3108_s13   ;;  %p2648_p0 = scmp.ge.s32.totalorder %s3108_s13, 1  ;;  %s3108_s13 = sphi %s3186_s13, %s21_s13  }
   0x2   : > { %p347_p1 = scmp.lt.s32.totalorder %s3108_s13, 3 }
   0x4   : > { %p348_p2 = pnand %p2648_p0, %p347_p1 }
   0x5   : > { %p399_p3 = scmp.lt.s32.totalorder (!%p348_p2), %s3192_s14, 1  ;;  %p2658_p4 = scmp.ne.s32.totalorder (!%p348_p2), %s3192_s14, 0 }
   0x6   : > { %351 = sbr.rel (%p348_p2) target bundleno = 4936 (0x1348), region = 60 }
   0xd   : > { %s400_s15 = scalar_select %p399_p3, %s3192_s14, 1 }
   0xe   : > { %426 = sbr.rel (%p2658_p4) target bundleno = 333 (0x14d), region = 64  ;;  %v427_v0 = vld [vmem:[%s3520_s0] sm:$0xff] (!%p2658_p4)  ;;  %vm431_vm0 = vcmask (!%p2658_p4), 261120   ;;  %v428_v1 = vld [vmem:[%s3520_s0 + $0x8] sm:$0xff] (!%p2658_p4) }
   0xf   : > { %s2703_s16 = sshll.u32 %s400_s15, 5  ;;  %s2706_s17 = sshll.u32 %s400_s15, 6  ;;  %v432_v2 = vsel (!%p2658_p4), %vm431_vm0, %v427_v0, 0.0  ;;  %v435_v3 = vsel (!%p2658_p4), %vm431_vm0, %v428_v1, 0.0  ;;  %v2659_v21 = vld [vmem:[%s3522_s2] ss:$0 sm:$0xff] (!%p2658_p4) }
  0x10   : > { %s3201_s20 = scalar_lea.vmem %s3525_s5, %s2703_s16  ;;  %s3206_s23 = scalar_lea.vmem %s3526_s6, %s2703_s16  ;;  %433 = vadd.xlane.f32.xlu0 (!%p2658_p4), %v432_v2  ;;  %v2660_v23 = vld [vmem:[%s3522_s2 + $0x1] ss:$0 sm:$0xff] (!%p2658_p4) }
  0x11   : > { %s3211_s26 = scalar_lea.vmem %s3527_s7, %s2703_s16  ;;  %s3216_s29 = scalar_lea.vmem %s3528_s8, %s2706_s17 }
  0x12   : > { %s2657_s30 = sshll.u32 %s400_s15, 3 }
  0x13   : > { %s3221_s18 = scalar_lea.vmem %s3529_s9, %s2657_s30 }
  0x14   : > { %436 = vadd.xlane.f32.xlu0 (!%p2658_p4), %v435_v3 }
  0x9d   : > { %v434_v4 = vpop.xlane.xlu0 %433 }
  0x9e   : > { %v439_v5 = vmul.f32 0.03125, %v434_v4 }
  0xa0   : > { %v441_v6 = vsub.f32 %v427_v0, %v439_v5 }
  0xa1   : > { %v437_v7 = vpop.xlane.xlu0 %436 }
  0xa2   : > { %v440_v8 = vmul.f32 0.03125, %v437_v7  ;;  %v443_v9 = vmul.f32 %v441_v6, %v441_v6 }
  0xa4   : > { %v442_v10 = vsub.f32 %v428_v1, %v440_v8  ;;  %v445_v11 = vsel %vm431_vm0, %v443_v9, 0.0 }
  0xa5   : > { %446 = vadd.xlane.f32.xlu1 %v445_v11 }
  0xa6   : > { %v444_v12 = vmul.f32 %v442_v10, %v442_v10 }
  0xa8   : > { %v448_v13 = vsel %vm431_vm0, %v444_v12, 0.0 }
  0xa9   : > { %449 = vadd.xlane.f32.xlu1 %v448_v13 }
 0x132   : > { %v447_v14 = vpop.xlane.xlu1 %446 }
 0x133   : > { %v451_v15 = vmul.f32 0.03125, %v447_v14 }
 0x135   : > { %v453_v16 = vadd.f32 1e-12, %v451_v15 }
 0x136   : > { %v450_v17 = vpop.xlane.xlu1 %449 }
 0x137   : > { %3018 = vrsqrt.f32 %v453_v16  ;;  %v452_v18 = vmul.f32 0.03125, %v450_v17 }
 0x139   : > { %v454_v19 = vadd.f32 1e-12, %v452_v18 }
 0x13b   : > { %3020 = vrsqrt.f32 %v454_v19 }
 0x141   : > { %v3019_v20 = vpop.eup %3018 }
 0x142   : > { %v457_v22 = vmul.f32 %v3019_v20, %v441_v6 }
 0x144   : > { %v463_v24 = vmul.f32 %v2659_v21, %v457_v22 }
 0x145   : > { %v3021_v25 = vpop.eup %3020 }
 0x146   : > { %v469_v26 = vadd.f32 %v2660_v23, %v463_v24  ;;  %v458_v27 = vmul.f32 %v3021_v25, %v442_v10 }
 0x148   : > { %471 = vst.msk [vmem:[#allocation2] sm:$0xff] %vm431_vm0, %v469_v26  ;;  %v464_v28 = vmul.f32 %v2659_v21, %v458_v27 }
 0x14a   : > { %v470_v29 = vadd.f32 %v2660_v23, %v464_v28 }
 0x14c   : > { %472 = vst.msk [vmem:[#allocation2 + $0x8] sm:$0xff] %vm431_vm0, %v470_v29 }
 0x14d PF: > { %v476_v30 = vld [vmem:[%s3201_s20] sm:$0xff]  ;;  %v477_v31 = vld [vmem:[%s3201_s20 + $0x8] sm:$0xff]  ;;  %v478_v32 = vld [vmem:[%s3201_s20 + $0x10] sm:$0xff]  ;;  %vm484_vm1 = vcmask 261120   ;;  %v3110_v38 = vmov 0.0   ;;  %v480_v39 = vlaneseq  ;;  %vm3111_vm2 = vmmov 0  }
 0x14e   : > { %v2931_v33 = vpack.c.bf16 %v477_v31, %v476_v30  ;;  %v479_v34 = vld [vmem:[%s3201_s20 + $0x18] sm:$0xff]  ;;  %2798 = vmatprep.subr.mxu0 %v3110_v38  ;;  %2800 = vmatprep.mubr.msk.f32.mxu0 %vm3111_vm2, %v3110_v38  ;;  %v3264_v42 = vld [vmem:[%s3221_s18] sm:$0xff]  ;;  %s3112_s20 = smov 96   ;;  %vm593_vm3 = vcmask 64512   ;;  %v3113_v50 = vmov 1966171168  }
 0x14f   : > { %v3246_v35 = vld [vmem:[#allocation2] sm:$0xff]  ;;  %v2935_v36 = vpack.c.bf16 %v479_v34, %v478_v32  ;;  %v3256_v40 = vshrl.u32 %v480_v39, 7  ;;  %v577_v51 = vunpack.c.l.s4 %v3113_v50  ;;  %s3114_s30 = smov 64   ;;  %s3115_s11 = smov 88   ;;  %vm1964_vm4 = vcmask 195584  }
 0x150   : > { %2785 = vmatprep.mubr.msk.f32.mxu1 %vm484_vm1, %v3246_v35  ;;  %2932 = vmatprep.subr.bf16.mxu1 %v2931_v33  ;;  %v2663_v54 = vld.sshfl [vmem:[%s3521_s1] sm:$0x11 pattern:$0x75316420]  ;;  %s3116_s12 = smov 120   ;;  %s3117_s18 = smov 56  }
 0x151   : > { %2934 = vmatpush3.bf16.msra.mxu1 %v2931_v33  ;;  %v482_v41 = vsub.s32 0, %v3256_v40  ;;  %v578_v52 = vunpack.c.0.s8 %v577_v51  ;;  %v575_v55 = vcombine.high %v2663_v54, %v2663_v54  ;;  %s3118_s19 = smov 80   ;;  %s3119_s21 = smov 112   ;;  %vm1961_vm5 = vcmask 130048  }
 0x152   : > { %2936 = vmatprep.subr.bf16.mxu1 %v2935_v36  ;;  %s3120_s16 = smov 48   ;;  %s3121_s22 = smov 72   ;;  %vm2252_vm8 = vcmask 523264  }
 0x153   : > { %v3250_v37 = vld [vmem:[#allocation2 + $0x8] sm:$0xff]  ;;  %v483_v43 = vrot.slane %v3264_v42, %v482_v41  ;;  %v581_v53 = vsub.s32 %v578_v52, %v3256_v40  ;;  %s3122_s15 = smov 104   ;;  %s3123_s17 = smov 40  }
 0x154   : > { %s3124_s24 = smov 8   ;;  %s3125_s25 = smov 16  }
 0x155   : > { %2938 = vmatpush3.bf16.msra.mxu1 %v2935_v36  ;;  %v582_v56 = vrot.slane %v2663_v54, %v581_v53  ;;  %v589_v58 = vrot.slane %v575_v55, %v581_v53  ;;  %p2694_p5 = scmp.ne.s32.totalorder %s3192_s14, 1 }
 0x156   : > { %2788 = vmatprep.subr.mxu1 %v3110_v38  ;;  %vm3128_vm9 = vmmov (!%p2694_p5), 0   ;;  %vm2393_vm10 = vcmask (!%p2694_p5), 1041409   ;;  %vm2549_vm11 = vcmask (!%p2694_p5), 9216  }
 0x157   : > { %v3289_v57 = vrot.slane %v582_v56, %v482_v41  ;;  %v3292_v63 = vrot.slane %v589_v58, %v482_v41 }
 0x158   : > { %2786 = vmatmul.mubr.msk.f32.vlgmr.msra.gmra.mrb[0].mxu1 %vm484_vm1, %v3250_v37 }
 0x159   : > { %2790 = vmatprep.mubr.msk.f32.mxu1 %vm3111_vm2, %v3110_v38 }
 0x22b   : > { %v2787_v44 = vpop.f32.mrb[0].mxu1 }
 0x22c   : > { %v557_v45 = vpop.f32.mrb[1].mxu1  ;;  %v3270_v47 = vadd.f32 %v2787_v44, %v483_v43 }
 0x22d   : > { %v3267_v46 = vadd.f32 %v557_v45, %v483_v43 }
 0x22f   : > { %591 = vrot.lane.b32.xlu0 %v3267_v46, %s3112_s20 }
 0x233   : > { %669 = vrot.lane.b32.xlu0 %v3270_v47, %s3112_s20  ;;  %s3126_s20 = smov 24  }
 0x2a1   : > { %v592_v48 = vpop.permute.xlu0 %591 }
 0x2a2   : > { %2789 = vmatpush3.xpose.msk.msra.mxu1 %vm593_vm3, %v592_v48 }
 0x2a3   : > { %2793 = vmatprep.subr.mxu1 %v3110_v38 }
 0x2a5   : > { %2791 = vmatmul.mubr.msk.f32.vlgmr.msra.gmra.mrb[2].mxu1 %vm593_vm3, %v3267_v46  ;;  %v670_v49 = vpop.permute.xlu0 %669 }
 0x2a6   : > { %2794 = vmatpush3.xpose.msk.msra.mxu1 %vm593_vm3, %v670_v49  ;;  %2795 = vmatprep.mubr.msk.f32.mxu1 %vm3111_vm2, %v3110_v38 }
 0x2a7   : > { %2803 = vmatprep.subr.mxu1 %v3110_v38 }
 0x2a9   : > { %2796 = vmatmul.mubr.msk.f32.vlgmr.msra.gmra.mrb[4].mxu1 %vm593_vm3, %v3270_v47 }
 0x2aa   : > { %2805 = vmatprep.mubr.msk.f32.mxu1 %vm3111_vm2, %v3110_v38 }
 0x378   : > { %v664_v59 = vpop.f32.mrb[2].mxu1 }
 0x379   : > { %v745_v60 = vmul.f32 0.35355338, %v664_v59  ;;  %v2792_v61 = vpop.f32.mrb[3].mxu1 }
 0x37b   : > { %v757_v62 = vadd.f32 %v3289_v57, %v745_v60 }
 0x37c   : > { %v741_v0 = vpop.f32.mrb[4].mxu1 }
 0x37d   : > { %v746_v1 = vmul.f32 0.35355338, %v741_v0  ;;  %v2797_v2 = vpop.f32.mrb[5].mxu1  ;;  %v759_v3 = vsel %vm593_vm3, %v757_v62, -inf }
 0x37e   : > { %760 = vmax.xlane.f32.xlu1 %v759_v3 }
 0x37f   : > { %v758_v4 = vadd.f32 %v3292_v63, %v746_v1 }
 0x381   : > { %v762_v5 = vsel %vm593_vm3, %v758_v4, -inf }
 0x382   : > { %763 = vmax.xlane.f32.xlu1 %v762_v5 }
 0x393   : > { %781 = vrot.lane.b32.xlu1 %v3267_v46, %s3114_s30 }
 0x397   : > { %857 = vrot.lane.b32.xlu1 %v3270_v47, %s3114_s30 }
 0x39b   : > { %935 = vrot.lane.b32.xlu1 %v3267_v46, %s3115_s11 }
 0x39f   : > { %1013 = vrot.lane.b32.xlu1 %v3270_v47, %s3115_s11 }
 0x40b   : > { %v761_v6 = vpop.xlane.xlu1 %760 }
 0x40c   : > { %v765_v7 = vsub.f32 %v757_v62, %v761_v6 }
 0x40e   : > { %v767_v8 = vmul.f32 1.442695, %v765_v7 }
 0x40f   : > { %v764_v9 = vpop.xlane.xlu1 %763 }
 0x410   : > { %3022 = vpow2.f32 %v767_v8  ;;  %v766_v10 = vsub.f32 %v758_v4, %v764_v9 }
 0x412   : > { %v769_v11 = vmul.f32 1.442695, %v766_v10 }
 0x413   : > { %v782_v12 = vpop.permute.xlu1 %781 }
 0x414   : > { %3024 = vpow2.f32 %v769_v11  ;;  %2799 = vmatpush3.msra.mxu0 %v782_v12 }
 0x415   : > { %2808 = vmatprep.subr.mxu0 %v3110_v38 }
 0x417   : > { %v858_v13 = vpop.permute.xlu1 %857 }
 0x418   : > { %2804 = vmatpush3.msra.mxu1 %v858_v13 }
 0x419   : > { %2813 = vmatprep.subr.mxu1 %v3110_v38 }
 0x41a   : > { %v3023_v14 = vpop.eup %3022 }
 0x41b   : > { %v771_v15 = vsel %vm593_vm3, %v3023_v14, 0.0  ;;  %v936_v18 = vpop.permute.xlu1 %935 }
 0x41c   : > { %772 = vadd.xlane.f32.xlu0 %v771_v15 }
 0x41e   : > { %v3025_v16 = vpop.eup %3024 }
 0x41f   : > { %v774_v17 = vsel %vm593_vm3, %v3025_v16, 0.0  ;;  %v1014_v19 = vpop.permute.xlu1 %1013 }
 0x420   : > { %775 = vadd.xlane.f32.xlu1 %v774_v17 }
 0x431   : > { %1011 = vrot.lane.b32.xlu1 %v3270_v47, %s3116_s12 }
 0x432   : > { %933 = vrot.lane.b32.xlu0 %v3267_v46, %s3116_s12 }
 0x4a9   : > { %v773_v20 = vpop.xlane.xlu0 %772 }
 0x4aa   : > { %3026 = vrcp.f32 %v773_v20 }
 0x4ad   : > { %v776_v21 = vpop.xlane.xlu1 %775  ;;  %v934_v26 = vpop.permute.xlu0 %933 }
 0x4ae   : > { %3028 = vrcp.f32 %v776_v21 }
 0x4b1   : > { %v1012_v27 = vpop.permute.xlu1 %1011 }
 0x4b4   : > { %v3027_v22 = vpop.eup %3026 }
 0x4b5   : > { %v778_v23 = vmul.f32 %v3027_v22, %v3023_v14 }
 0x4b7   : > { %2801 = vmatmul.mubr.msk.f32.vlgmr.msra.gmra.mrb[0].mxu0 %vm593_vm3, %v778_v23 }
 0x4b8   : > { %v3029_v24 = vpop.eup %3028  ;;  %2809 = vmatpush3.xpose.msk.msra.mxu0 %vm593_vm3, %v936_v18  ;;  %2810 = vmatprep.mubr.msk.f32.mxu0 %vm3111_vm2, %v3110_v38 }
 0x4b9   : > { %v780_v25 = vmul.f32 %v3029_v24, %v3025_v16  ;;  %2818 = vmatprep.subr.mxu0 %v3110_v38 }
 0x4bb   : > { %2806 = vmatmul.mubr.msk.f32.vlgmr.msra.gmra.mrb[6].mxu1 %vm593_vm3, %v780_v25  ;;  %2811 = vmatmul.mubr.msk.f32.vlgmr.msra.gmra.mrb[2].mxu0 %vm593_vm3, %v934_v26 }
 0x4bc   : > { %2814 = vmatpush3.xpose.msk.msra.mxu1 %vm593_vm3, %v1014_v19  ;;  %2815 = vmatprep.mubr.msk.f32.mxu1 %vm3111_vm2, %v3110_v38 }
 0x4bd   : > { %2823 = vmatprep.subr.mxu1 %v3110_v38  ;;  %2820 = vmatprep.mubr.msk.f32.mxu0 %vm3111_vm2, %v3110_v38 }
 0x4bf   : > { %2816 = vmatmul.mubr.msk.f32.vlgmr.msra.gmra.mrb[8].mxu1 %vm593_vm3, %v1012_v27 }
 0x4c0   : > { %2825 = vmatprep.mubr.msk.f32.mxu1 %vm3111_vm2, %v3110_v38 }
 0x58a   : > { %v3323_v28 = vpop.f32.mrb[0].mxu0 }
 0x58b   : > { %v2802_v29 = vpop.f32.mrb[1].mxu0 }
 0x58e   : > { %v3325_v30 = vpop.f32.mrb[6].mxu1  ;;  %v1007_v31 = vpop.f32.mrb[2].mxu0 }
 0x58f   : > { %v1089_v32 = vmul.f32 0.35355338, %v1007_v31  ;;  %v2807_v33 = vpop.f32.mrb[7].mxu1  ;;  %v2812_v34 = vpop.f32.mrb[3].mxu0 }
 0x591   : > { %v1091_v36 = vadd.f32 %v1089_v32, %v3289_v57 }
 0x592   : > { %v1085_v39 = vpop.f32.mrb[8].mxu1 }
 0x593   : > { %v1090_v41 = vmul.f32 0.35355338, %v1085_v39  ;;  %v2817_v43 = vpop.f32.mrb[9].mxu1  ;;  %v1093_v44 = vsel %vm593_vm3, %v1091_v36, -inf }
 0x594   : > { %1094 = vmax.xlane.f32.xlu1 %v1093_v44 }
 0x595   : > { %v1092_v45 = vadd.f32 %v1090_v41, %v3292_v63 }
 0x597   : > { %v1096_v48 = vsel %vm593_vm3, %v1092_v45, -inf }
 0x598   : > { %1097 = vmax.xlane.f32.xlu0 %v1096_v48 }
 0x5a5   : > { %1115 = vrot.lane.b32.xlu1 %v3267_v46, %s3117_s18 }
 0x5a9   : > { %1269 = vrot.lane.b32.xlu1 %v3267_v46, %s3118_s19 }
 0x5ad   : > { %1347 = vrot.lane.b32.xlu1 %v3270_v47, %s3118_s19 }
 0x5ae   : > { %1191 = vrot.lane.b32.xlu0 %v3270_v47, %s3117_s18 }
 0x5b2   : > { %1267 = vrot.lane.b32.xlu0 %v3267_v46, %s3119_s21 }
 0x621   : > { %v1095_v49 = vpop.xlane.xlu1 %1094 }
 0x622   : > { %v1099_v50 = vsub.f32 %v1091_v36, %v1095_v49 }
 0x624   : > { %v1101_v51 = vmul.f32 1.442695, %v1099_v50 }
 0x625   : > { %v1116_v52 = vpop.permute.xlu1 %1115  ;;  %v1098_v53 = vpop.xlane.xlu0 %1097 }
 0x626   : > { %3030 = vpow2.f32 %v1101_v51  ;;  %v1100_v54 = vsub.f32 %v1092_v45, %v1098_v53  ;;  %2819 = vmatpush3.msra.mxu0 %v1116_v52 }
 0x627   : > { %2828 = vmatprep.subr.mxu0 %v3110_v38 }
 0x628   : > { %v1103_v55 = vmul.f32 1.442695, %v1100_v54 }
 0x629   : > { %v1192_v56 = vpop.permute.xlu0 %1191  ;;  %v1270_v62 = vpop.permute.xlu1 %1269 }
 0x62a   : > { %3032 = vpow2.f32 %v1103_v55  ;;  %2824 = vmatpush3.msra.mxu1 %v1192_v56 }
 0x62b   : > { %2833 = vmatprep.subr.mxu1 %v3110_v38 }
 0x62d   : > { %v1348_v0 = vpop.permute.xlu1 %1347  ;;  %v1268_v7 = vpop.permute.xlu0 %1267 }
 0x630   : > { %v3031_v58 = vpop.eup %3030 }
 0x631   : > { %v1105_v59 = vsel %vm593_vm3, %v3031_v58, 0.0 }
 0x632   : > { %1106 = vadd.xlane.f32.xlu1 %v1105_v59 }
 0x634   : > { %v3033_v60 = vpop.eup %3032 }
 0x635   : > { %v1108_v61 = vsel %vm593_vm3, %v3033_v60, 0.0 }
 0x636   : > { %1109 = vadd.xlane.f32.xlu1 %v1108_v61 }
 0x647   : > { %1345 = vrot.lane.b32.xlu1 %v3270_v47, %s3119_s21 }
 0x6bf   : > { %v1107_v1 = vpop.xlane.xlu1 %1106 }
 0x6c0   : > { %3034 = vrcp.f32 %v1107_v1 }
 0x6c3   : > { %v1110_v2 = vpop.xlane.xlu1 %1109 }
 0x6c4   : > { %3036 = vrcp.f32 %v1110_v2 }
 0x6c7   : > { %v1346_v8 = vpop.permute.xlu1 %1345 }
 0x6ca   : > { %v3035_v3 = vpop.eup %3034 }
 0x6cb   : > { %v1112_v4 = vmul.f32 %v3035_v3, %v3031_v58 }
 0x6cd   : > { %2821 = vmatmul.mubr.msk.f32.vlgmr.msra.gmra.mrb[4].mxu0 %vm593_vm3, %v1112_v4 }
 0x6ce   : > { %v3037_v5 = vpop.eup %3036  ;;  %2829 = vmatpush3.xpose.msk.msra.mxu0 %vm593_vm3, %v1270_v62  ;;  %2830 = vmatprep.mubr.msk.f32.mxu0 %vm3111_vm2, %v3110_v38 }
 0x6cf   : > { %v1114_v6 = vmul.f32 %v3037_v5, %v3033_v60  ;;  %2838 = vmatprep.subr.mxu0 %v3110_v38 }
 0x6d1   : > { %2826 = vmatmul.mubr.msk.f32.vlgmr.msra.gmra.mrb[10].mxu1 %vm593_vm3, %v1114_v6  ;;  %2831 = vmatmul.mubr.msk.f32.vlgmr.msra.gmra.mrb[6].mxu0 %vm593_vm3, %v1268_v7 }
 0x6d2   : > { %2834 = vmatpush3.xpose.msk.msra.mxu1 %vm593_vm3, %v1348_v0  ;;  %2835 = vmatprep.mubr.msk.f32.mxu1 %vm3111_vm2, %v3110_v38 }
 0x6d3   : > { %2843 = vmatprep.subr.mxu1 %v3110_v38  ;;  %2840 = vmatprep.mubr.msk.f32.mxu0 %vm3111_vm2, %v3110_v38 }
 0x6d5   : > { %2836 = vmatmul.mubr.msk.f32.vlgmr.msra.gmra.mrb[12].mxu1 %vm593_vm3, %v1346_v8 }
 0x6d6   : > { %2845 = vmatprep.mubr.msk.f32.mxu1 %vm3111_vm2, %v3110_v38 }
 0x7a0   : > { %v3357_v9 = vpop.f32.mrb[4].mxu0 }
 0x7a1   : > { %v2822_v10 = vpop.f32.mrb[5].mxu0 }
 0x7a4   : > { %v3359_v11 = vpop.f32.mrb[10].mxu1  ;;  %v1341_v12 = vpop.f32.mrb[6].mxu0 }
 0x7a5   : > { %v1423_v13 = vmul.f32 0.35355338, %v1341_v12  ;;  %v2827_v14 = vpop.f32.mrb[11].mxu1  ;;  %v2832_v15 = vpop.f32.mrb[7].mxu0 }
 0x7a7   : > { %v1425_v16 = vadd.f32 %v1423_v13, %v3289_v57 }
 0x7a8   : > { %v1419_v17 = vpop.f32.mrb[12].mxu1 }
 0x7a9   : > { %v1424_v18 = vmul.f32 0.35355338, %v1419_v17  ;;  %v2837_v19 = vpop.f32.mrb[13].mxu1  ;;  %v1427_v20 = vsel %vm593_vm3, %v1425_v16, -inf }
 0x7aa   : > { %1428 = vmax.xlane.f32.xlu0 %v1427_v20  ;;  %v1967_v20 = vld [vmem:[%s3206_s23] sm:$0xff] }
 0x7ab   : > { %v1426_v21 = vadd.f32 %v1424_v18, %v3292_v63 }
 0x7ad   : > { %v1430_v22 = vsel %vm593_vm3, %v1426_v21, -inf }
 0x7ae   : > { %1431 = vmax.xlane.f32.xlu1 %v1430_v22  ;;  %v1969_v22 = vld [vmem:[%s3206_s23 + $0x10] sm:$0xff] }
 0x7bf   : > { %1449 = vrot.lane.b32.xlu1 %v3267_v46, %s3120_s16 }
 0x7c0   : > { %1525 = vrot.lane.b32.xlu0 %v3270_v47, %s3120_s16 }
 0x7c3   : > { %1603 = vrot.lane.b32.xlu1 %v3267_v46, %s3121_s22 }
 0x7c7   : > { %1681 = vrot.lane.b32.xlu1 %v3270_v47, %s3121_s22 }
 0x7cb   : > { %1679 = vrot.lane.b32.xlu1 %v3270_v47, %s3122_s15 }
 0x837   : > { %v1429_v23 = vpop.xlane.xlu0 %1428 }
 0x838   : > { %v1433_v24 = vsub.f32 %v1425_v16, %v1429_v23  ;;  %v1970_v23 = vld [vmem:[%s3206_s23 + $0x18] sm:$0xff] }
 0x83a   : > { %v1435_v25 = vmul.f32 1.442695, %v1433_v24  ;;  %v2943_v24 = vpack.c.bf16 %v1970_v23, %v1969_v22  ;;  %v2240_v23 = vld [vmem:[%s3216_s29] sm:$0xff] }
 0x83b   : > { %v1432_v26 = vpop.xlane.xlu1 %1431  ;;  %v1526_v27 = vpop.permute.xlu0 %1525 }
 0x83c   : > { %3038 = vpow2.f32 %v1435_v25  ;;  %v1434_v29 = vsub.f32 %v1426_v21, %v1432_v26  ;;  %2844 = vmatpush3.msra.mxu1 %v1526_v27  ;;  %v1968_v21 = vld [vmem:[%s3206_s23 + $0x8] sm:$0xff] }
 0x83d   : > { %2853 = vmatprep.subr.mxu1 %v3110_v38 }
 0x83e   : > { %v1437_v31 = vmul.f32 1.442695, %v1434_v29 }
 0x83f   : > { %v1450_v32 = vpop.permute.xlu1 %1449 }
 0x840   : > { %3040 = vpow2.f32 %v1437_v31  ;;  %2839 = vmatpush3.msra.mxu0 %v1450_v32 }
 0x841   : > { %2848 = vmatprep.subr.mxu0 %v3110_v38 }
 0x843   : > { %v1604_v44 = vpop.permute.xlu1 %1603 }
 0x846   : > { %v3039_v33 = vpop.eup %3038 }
 0x847   : > { %v1439_v34 = vsel %vm593_vm3, %v3039_v33, 0.0  ;;  %v1682_v50 = vpop.permute.xlu1 %1681 }
 0x848   : > { %1440 = vadd.xlane.f32.xlu0 %v1439_v34 }
 0x84a   : > { %v3041_v36 = vpop.eup %3040 }
 0x84b   : > { %v1442_v39 = vsel %vm593_vm3, %v3041_v36, 0.0  ;;  %v1680_v53 = vpop.permute.xlu1 %1679 }
 0x84c   : > { %1443 = vadd.xlane.f32.xlu0 %v1442_v39 }
 0x862   : > { %1601 = vrot.lane.b32.xlu0 %v3267_v46, %s3122_s15 }
 0x8d5   : > { %v1441_v41 = vpop.xlane.xlu0 %1440 }
 0x8d6   : > { %3042 = vrcp.f32 %v1441_v41 }
 0x8d9   : > { %v1444_v43 = vpop.xlane.xlu0 %1443 }
 0x8da   : > { %3044 = vrcp.f32 %v1444_v43 }
 0x8dd   : > { %v1602_v52 = vpop.permute.xlu0 %1601 }
 0x8e0   : > { %v3043_v45 = vpop.eup %3042 }
 0x8e1   : > { %v1446_v48 = vmul.f32 %v3043_v45, %v3039_v33 }
 0x8e3   : > { %2841 = vmatmul.mubr.msk.f32.vlgmr.msra.gmra.mrb[8].mxu0 %vm593_vm3, %v1446_v48 }
 0x8e4   : > { %v3045_v49 = vpop.eup %3044  ;;  %2849 = vmatpush3.xpose.msk.msra.mxu0 %vm593_vm3, %v1604_v44  ;;  %2850 = vmatprep.mubr.msk.f32.mxu0 %vm3111_vm2, %v3110_v38 }
 0x8e5   : > { %v1448_v51 = vmul.f32 %v3045_v49, %v3041_v36  ;;  %2858 = vmatprep.subr.mxu0 %v3110_v38 }
 0x8e7   : > { %2846 = vmatmul.mubr.msk.f32.vlgmr.msra.gmra.mrb[14].mxu1 %vm593_vm3, %v1448_v51  ;;  %2851 = vmatmul.mubr.msk.f32.vlgmr.msra.gmra.mrb[10].mxu0 %vm593_vm3, %v1602_v52 }
 0x8e8   : > { %2854 = vmatpush3.xpose.msk.msra.mxu1 %vm593_vm3, %v1682_v50  ;;  %2855 = vmatprep.mubr.msk.f32.mxu1 %vm3111_vm2, %v3110_v38  ;;  %v1973_v50 = vsub.s32 1, %v3256_v40 }
 0x8e9   : > { %2863 = vmatprep.subr.mxu1 %v3110_v38  ;;  %2860 = vmatprep.mubr.msk.f32.mxu0 %vm3111_vm2, %v3110_v38 }
 0x8ea   : > { %v1974_v51 = vrot.slane %v3264_v42, %v1973_v50 }
 0x8eb   : > { %2856 = vmatmul.mubr.msk.f32.vlgmr.msra.gmra.mrb[16].mxu1 %vm593_vm3, %v1680_v53 }
 0x8ec   : > { %2865 = vmatprep.mubr.msk.f32.mxu1 %vm3111_vm2, %v3110_v38 }
 0x9b6   : > { %v1521_v54 = vpop.f32.mrb[8].mxu0 }
 0x9b7   : > { %v2842_v55 = vpop.f32.mrb[9].mxu0 }
 0x9ba   : > { %v1597_v56 = vpop.f32.mrb[14].mxu1  ;;  %v1675_v58 = vpop.f32.mrb[10].mxu0 }
 0x9bb   : > { %v1757_v59 = vmul.f32 0.35355338, %v1675_v58  ;;  %v2847_v60 = vpop.f32.mrb[15].mxu1  ;;  %v2852_v61 = vpop.f32.mrb[11].mxu0 }
 0x9bd   : > { %v1759_v62 = vadd.f32 %v1757_v59, %v3289_v57 }
 0x9be   : > { %v1753_v0 = vpop.f32.mrb[16].mxu1 }
 0x9bf   : > { %v1758_v1 = vmul.f32 0.35355338, %v1753_v0  ;;  %v2857_v2 = vpop.f32.mrb[17].mxu1  ;;  %v1761_v3 = vsel %vm593_vm3, %v1759_v62, -inf }
 0x9c0   : > { %1762 = vmax.xlane.f32.xlu0 %v1761_v3 }
 0x9c1   : > { %v1760_v4 = vadd.f32 %v1758_v1, %v3292_v63 }
 0x9c3   : > { %v1764_v5 = vsel %vm593_vm3, %v1760_v4, -inf }
 0x9c4   : > { %1765 = vmax.xlane.f32.xlu1 %v1764_v5  ;;  %v2098_v5 = vld [vmem:[%s3211_s26 + $0x8] sm:$0xff] }
 0x9d5   : > { %1783 = vrot.lane.b32.xlu1 %v3267_v46, %s3123_s17 }
 0x9d9   : > { %1937 = vrot.lane.b32.xlu1 %v3357_v9, %s3124_s24 }
 0x9dd   : > { %1939 = vrot.lane.b32.xlu1 %v3359_v11, %s3124_s24 }
 0x9e1   : > { %1947 = vrot.lane.b32.xlu1 %v1597_v56, %s3125_s25 }
 0xa4d   : > { %v1763_v38 = vpop.xlane.xlu0 %1762 }
 0xa4e   : > { %v1767_v57 = vsub.f32 %v1759_v62, %v1763_v38 }
 0xa50   : > { %v1769_v6 = vmul.f32 1.442695, %v1767_v57  ;;  %v2099_v57 = vld [vmem:[%s3211_s26 + $0x10] sm:$0xff] }
 0xa51   : > { %v1766_v7 = vpop.xlane.xlu1 %1765 }
 0xa52   : > { %3046 = vpow2.f32 %v1769_v6  ;;  %v1768_v8 = vsub.f32 %v1760_v4, %v1766_v7  ;;  %v2097_v4 = vld [vmem:[%s3211_s26] sm:$0xff]  ;;  %v2100_v6 = vld [vmem:[%s3211_s26 + $0x18] sm:$0xff] }
 0xa53   : > { %v2947_v38 = vpack.c.bf16 %v2098_v5, %v2097_v4  ;;  %v2951_v7 = vpack.c.bf16 %v2100_v6, %v2099_v57 }
 0xa54   : > { %v1771_v63 = vmul.f32 1.442695, %v1768_v8 }
 0xa55   : > { %v1784_v10 = vpop.permute.xlu1 %1783 }
 0xa56   : > { %3048 = vpow2.f32 %v1771_v63  ;;  %2859 = vmatpush3.msra.mxu0 %v1784_v10 }
 0xa59   : > { %v1938_v31 = vpop.permute.xlu1 %1937 }
 0xa5a   : > { %v1959_v34 = vsel %vm593_vm3, %v3323_v28, %v1938_v31  ;;  %v2244_v31 = vld [vmem:[%s3216_s29 + $0x20] sm:$0xff] }
 0xa5c   : > { %v3047_v12 = vpop.eup %3046 }
 0xa5d   : > { %v1773_v46 = vsel %vm593_vm3, %v3047_v12, 0.0  ;;  %v1940_v32 = vpop.permute.xlu1 %1939 }
 0xa5e   : > { %1774 = vadd.xlane.f32.xlu0 %v1773_v46  ;;  %v1960_v44 = vsel %vm593_vm3, %v3325_v30, %v1940_v32  ;;  %v2245_v32 = vld [vmem:[%s3216_s29 + $0x28] sm:$0xff] }
 0xa60   : > { %v3049_v13 = vpop.eup %3048 }
 0xa61   : > { %v1776_v9 = vsel %vm593_vm3, %v3049_v13, 0.0  ;;  %v1948_v36 = vpop.permute.xlu1 %1947 }
 0xa62   : > { %1777 = vadd.xlane.f32.xlu0 %v1776_v9  ;;  %v1963_v45 = vsel %vm1961_vm5, %v1960_v44, %v1948_v36  ;;  %v2087_v9 = vsub.s32 2, %v3256_v40  ;;  %v2247_v36 = vld [vmem:[%s3216_s29 + $0x38] sm:$0xff] }
 0xa78   : > { %1859 = vrot.lane.b32.xlu0 %v3270_v47, %s3123_s17  ;;  %v2939_v47 = vpack.c.bf16 %v1968_v21, %v1967_v20 }
 0xa7a   : > { %2940 = vmatprep.subr.bf16.mxu0 %v2939_v47 }
 0xa7c   : > { %1945 = vrot.lane.b32.xlu0 %v1521_v54, %s3125_s25 }
 0xaeb   : > { %v1775_v11 = vpop.xlane.xlu0 %1774 }
 0xaec   : > { %3050 = vrcp.f32 %v1775_v11  ;;  %v2093_v11 = vsub.s32 3, %v3256_v40 }
 0xaef   : > { %v1778_v14 = vpop.xlane.xlu0 %1777 }
 0xaf0   : > { %3052 = vrcp.f32 %v1778_v14  ;;  %v2088_v14 = vrot.slane %v3264_v42, %v2087_v9 }
 0xaf3   : > { %v1860_v15 = vpop.permute.xlu0 %1859 }
 0xaf4   : > { %2864 = vmatpush3.msra.mxu1 %v1860_v15 }
 0xaf5   : > { %2948 = vmatprep.subr.bf16.mxu1 %v2947_v38 }
 0xaf6   : > { %v3051_v16 = vpop.eup %3050 }
 0xaf7   : > { %v1780_v17 = vmul.f32 %v3051_v16, %v3047_v12  ;;  %v1946_v33 = vpop.permute.xlu0 %1945 }
 0xaf8   : > { %v1962_v39 = vsel %vm1961_vm5, %v1959_v34, %v1946_v33  ;;  %v2963_v33 = vpack.c.bf16 %v2245_v32, %v2244_v31  ;;  %v2246_v34 = vld [vmem:[%s3216_s29 + $0x30] sm:$0xff] }
 0xaf9   : > { %2861 = vmatmul.mubr.msk.f32.vlgmr.msra.gmra.mrb[12].mxu0 %vm593_vm3, %v1780_v17  ;;  %v2094_v17 = vrot.slane %v3264_v42, %v2093_v11 }
 0xafa   : > { %v3053_v18 = vpop.eup %3052  ;;  %2942 = vmatpush3.bf16.msra.mxu0 %v2939_v47 }
 0xafb   : > { %v1782_v19 = vmul.f32 %v3053_v18, %v3049_v13  ;;  %2944 = vmatprep.subr.bf16.mxu0 %v2943_v24 }
 0xafd   : > { %2866 = vmatmul.mubr.msk.f32.vlgmr.msra.gmra.mrb[18].mxu1 %vm593_vm3, %v1782_v19 }
 0xafe   : > { %2946 = vmatpush3.bf16.msra.mxu0 %v2943_v24  ;;  %2950 = vmatpush3.bf16.msra.mxu1 %v2947_v38  ;;  %v2241_v24 = vld [vmem:[%s3216_s29 + $0x8] sm:$0xff] }
 0xaff   : > { %2952 = vmatprep.subr.bf16.mxu1 %v2951_v7 }
 0xb02   : > { %2954 = vmatpush3.bf16.msra.mxu1 %v2951_v7 }
 0xbcc   : > { %v1855_v25 = vpop.f32.mrb[12].mxu0 }
 0xbcd   : > { %1953 = vrot.lane.b32.xlu0 %v1855_v25, %s3126_s20  ;;  %v2862_v26 = vpop.f32.mrb[13].mxu0  ;;  %v2955_v25 = vpack.c.bf16 %v2241_v24, %v2240_v23 }
 0xbce   : > { %v2242_v26 = vld [vmem:[%s3216_s29 + $0x10] sm:$0xff] }
 0xbcf   : > { %2956 = vmatprep.subr.bf16.mxu0 %v2955_v25 }
 0xbd0   : > { %v1931_v27 = vpop.f32.mrb[18].mxu1 }
 0xbd1   : > { %1955 = vrot.lane.b32.xlu1 %v1931_v27, %s3126_s20  ;;  %v2867_v29 = vpop.f32.mrb[19].mxu1  ;;  %v2243_v27 = vld [vmem:[%s3216_s29 + $0x18] sm:$0xff] }
 0xbd2   : > { %v2959_v29 = vpack.c.bf16 %v2243_v27, %v2242_v26 }
 0xc3f   : > { %v1954_v41 = vpop.permute.xlu0 %1953 }
 0xc40   : > { %v1965_v43 = vsel %vm1964_vm4, %v1962_v39, %v1954_v41  ;;  %v2967_v39 = vpack.c.bf16 %v2247_v36, %v2246_v34  ;;  %v2103_v41 = vsub.s32 4, %v3256_v40 }
 0xc41   : > { %2876 = vmatprep.mubr.msk.f32.mxu0 %vm484_vm1, %v1965_v43 }
 0xc42   : > { %v2104_v43 = vrot.slane %v3264_v42, %v2103_v41 }
 0xc43   : > { %v1956_v48 = vpop.permute.xlu1 %1955 }
 0xc44   : > { %v1966_v49 = vsel %vm1964_vm4, %v1963_v45, %v1956_v48 }
 0xc45   : > { %2877 = vmatmul.mubr.msk.f32.vlgmr.msra.gmra.mrb[14].mxu0 %vm484_vm1, %v1966_v49 }
 0xc46   : > { %2958 = vmatpush3.bf16.msra.mxu0 %v2955_v25 }
 0xc47   : > { %2960 = vmatprep.subr.bf16.mxu0 %v2959_v29 }
 0xc4a   : > { %2962 = vmatpush3.bf16.msra.mxu0 %v2959_v29 }
 0xc4b   : > { %2964 = vmatprep.subr.bf16.mxu0 %v2963_v33 }
 0xc4e   : > { %2966 = vmatpush3.bf16.msra.mxu0 %v2963_v33  ;;  %v2250_v33 = vsub.s32 5, %v3256_v40 }
 0xc4f   : > { %2968 = vmatprep.subr.bf16.mxu0 %v2967_v39 }
 0xc50   : > { %v2251_v34 = vrot.slane %v3264_v42, %v2250_v33 }
 0xc52   : > { %2970 = vmatpush3.bf16.msra.mxu0 %v2967_v39 }
 0xd18   : > { %v2878_v28 = vpop.f32.mrb[14].mxu0 }
 0xd19   : > { %v2053_v52 = vadd.f32 %v2878_v28, %v1974_v51  ;;  %v2047_v53 = vpop.f32.mrb[15].mxu0 }
 0xd1a   : > { %v2048_v54 = vadd.f32 %v2047_v53, %v1974_v51 }
 0xd1b   : > { %v2057_v55 = vadd.f32 %v2053_v52, %v3250_v37 }
 0xd1c   : > { %v2056_v56 = vadd.f32 %v2048_v54, %v3246_v35 }
 0xd1d   : > { %v2061_v58 = vsel %vm484_vm1, %v2057_v55, 0.0 }
 0xd1e   : > { %2062 = vadd.xlane.f32.xlu1 %v2061_v58  ;;  %v2058_v30 = vsel %vm484_vm1, %v2056_v56, 0.0 }
 0xd1f   : > { %2059 = vadd.xlane.f32.xlu0 %v2058_v30 }
 0xdab   : > { %v2063_v59 = vpop.xlane.xlu1 %2062 }
 0xdac   : > { %v2066_v60 = vmul.f32 0.03125, %v2063_v59  ;;  %v2060_v61 = vpop.xlane.xlu0 %2059 }
 0xdad   : > { %v2065_v62 = vmul.f32 0.03125, %v2060_v61 }
 0xdae   : > { %v2068_v0 = vsub.f32 %v2057_v55, %v2066_v60 }
 0xdaf   : > { %v2067_v1 = vsub.f32 %v2056_v56, %v2065_v62 }
 0xdb0   : > { %v2070_v35 = vmul.f32 %v2068_v0, %v2068_v0 }
 0xdb1   : > { %v2069_v2 = vmul.f32 %v2067_v1, %v2067_v1 }
 0xdb2   : > { %v2074_v3 = vsel %vm484_vm1, %v2070_v35, 0.0 }
 0xdb3   : > { %v2071_v37 = vsel %vm484_vm1, %v2069_v2, 0.0 }
 0xdb4   : > { %2072 = vadd.xlane.f32.xlu0 %v2071_v37 }
 0xdb8   : > { %2075 = vadd.xlane.f32.xlu0 %v2074_v3 }
 0xe41   : > { %v2073_v8 = vpop.xlane.xlu0 %2072 }
 0xe42   : > { %v2077_v63 = vmul.f32 0.03125, %v2073_v8 }
 0xe44   : > { %v2079_v10 = vadd.f32 1e-12, %v2077_v63 }
 0xe45   : > { %v2076_v12 = vpop.xlane.xlu0 %2075 }
 0xe46   : > { %3054 = vrsqrt.f32 %v2079_v10  ;;  %v2078_v46 = vmul.f32 0.03125, %v2076_v12 }
 0xe48   : > { %v2080_v13 = vadd.f32 1e-12, %v2078_v46 }
 0xe4a   : > { %3056 = vrsqrt.f32 %v2080_v13 }
 0xe50   : > { %v3055_v15 = vpop.eup %3054 }
 0xe51   : > { %v2083_v16 = vmul.f32 %v3055_v15, %v2067_v1 }
 0xe53   : > { %v2089_v18 = vmul.f32 %v2088_v14, %v2083_v16 }
 0xe54   : > { %v3057_v19 = vpop.eup %3056 }
 0xe55   : > { %v2084_v20 = vmul.f32 %v3057_v19, %v2068_v0  ;;  %v3429_v21 = vadd.f32 %v2094_v17, %v2089_v18 }
 0xe57   : > { %v2090_v47 = vmul.f32 %v2088_v14, %v2084_v20  ;;  %2887 = vmatprep.mubr.msk.f32.mxu1 %vm484_vm1, %v3429_v21 }
 0xe59   : > { %v3433_v22 = vadd.f32 %v2094_v17, %v2090_v47 }
 0xe5b   : > { %2888 = vmatmul.mubr.msk.f32.vlgmr.msra.gmra.mrb[20].mxu1 %vm484_vm1, %v3433_v22 }
 0xf2e   : > { %v2889_v44 = vpop.f32.mrb[20].mxu1 }
 0xf2f   : > { %v2183_v45 = vadd.f32 %v2889_v44, %v2104_v43  ;;  %v2177_v48 = vpop.f32.mrb[21].mxu1 }
 0xf30   : > { %v2178_v49 = vadd.f32 %v2177_v48, %v2104_v43 }
 0xf31   : > { %v2189_v50 = vmul.f32 0.70710677, %v2183_v45  ;;  %v2187_v29 = vmul.f32 0.5, %v2183_v45 }
 0xf32   : > { %v2188_v51 = vmul.f32 0.70710677, %v2178_v49  ;;  %v2186_v26 = vmul.f32 0.5, %v2178_v49 }
 0xf33   : > { %v2191_v28 = vand.u32 2147483647, %v2189_v50  ;;  %vm2231_vm6 = vcmp.ge.f32.partialorder %v2189_v50, 0.0 }
 0xf34   : > { %v2190_v52 = vand.u32 2147483647, %v2188_v51  ;;  %vm2230_vm7 = vcmp.ge.f32.partialorder %v2188_v51, 0.0 }
 0xf35   : > { %v2193_v53 = vmul.f32 0.3275911, %v2191_v28  ;;  %v2219_v58 = vsub.f32 0.0, %v2191_v28 }
 0xf36   : > { %v2192_v54 = vmul.f32 0.3275911, %v2190_v52  ;;  %v2218_v30 = vsub.f32 0.0, %v2190_v52 }
 0xf37   : > { %v2195_v55 = vadd.f32 1.0, %v2193_v53  ;;  %v2221_v60 = vmul.f32 %v2219_v58, %v2191_v28 }
 0xf38   : > { %v2194_v56 = vadd.f32 1.0, %v2192_v54  ;;  %v2220_v0 = vmul.f32 %v2218_v30, %v2190_v52 }
 0xf39   : > { %3058 = vrcp.f32 %v2195_v55  ;;  %v2224_v37 = vmul.f32 1.442695, %v2221_v60 }
 0xf3a   : > { %3060 = vrcp.f32 %v2194_v56  ;;  %v2222_v4 = vmul.f32 1.442695, %v2220_v0  ;;  %v2364_v0 = vsub.s32 6, %v3256_v40 }
 0xf3b   : > { %3062 = vpow2.f32 %v2224_v37 }
 0xf3c   : > { %3064 = vpow2.f32 %v2222_v4 }
 0xf43   : > { %v3059_v59 = vpop.eup %3058 }
 0xf44   : > { %v3061_v61 = vpop.eup %3060  ;;  %v2201_v62 = vmul.f32 1.0614054, %v3059_v59 }
 0xf45   : > { %v2200_v1 = vmul.f32 1.0614054, %v3061_v61  ;;  %v3063_v11 = vpop.eup %3062 }
 0xf46   : > { %v2203_v2 = vadd.f32 -1.4531521, %v2201_v62  ;;  %v3065_v15 = vpop.eup %3064 }
 0xf47   : > { %v2202_v35 = vadd.f32 -1.4531521, %v2200_v1  ;;  %v2370_v1 = vsub.s32 7, %v3256_v40  ;;  %v2382_v40 = vld [vmem:[%s3523_s3] sm:$0xff] (!%p2694_p5) }
 0xf48   : > { %v2205_v3 = vmul.f32 %v3059_v59, %v2203_v2  ;;  %v2365_v2 = vrot.slane %v3264_v42, %v2364_v0 }
 0xf49   : > { %v2204_v5 = vmul.f32 %v3061_v61, %v2202_v35 }
 0xf4a   : > { %v2207_v38 = vadd.f32 1.4214138, %v2205_v3  ;;  %v2371_v3 = vrot.slane %v3264_v42, %v2370_v1  ;;  %v2383_v42 = vld [vmem:[%s3523_s3 + $0x8] sm:$0xff] (!%p2694_p5) }
 0xf4b   : > { %v2206_v57 = vadd.f32 1.4214138, %v2204_v5 }
 0xf4c   : > { %v2209_v6 = vmul.f32 %v3059_v59, %v2207_v38 }
 0xf4d   : > { %v2208_v7 = vmul.f32 %v3061_v61, %v2206_v57 }
 0xf4e   : > { %v2211_v8 = vadd.f32 -0.28449672, %v2209_v6 }
 0xf4f   : > { %v2210_v63 = vadd.f32 -0.28449672, %v2208_v7 }
 0xf50   : > { %v2213_v10 = vmul.f32 %v3059_v59, %v2211_v8  ;;  %v2384_v8 = vld [vmem:[%s3523_s3 + $0x10] sm:$0xff] (!%p2694_p5) }
 0xf51   : > { %v2212_v12 = vmul.f32 %v3061_v61, %v2210_v63  ;;  %v3127_v63 = vmov (!%p2694_p5), 0.0|0.0  }
 0xf52   : > { %v2215_v46 = vadd.f32 0.2548296, %v2213_v10  ;;  %2971 = vmatprep.subr.bf16.mxu0 (!%p2694_p5), %v3127_v63  ;;  %v2972_v10 = vpack.c.bf16 (!%p2694_p5), %v2383_v42, %v2382_v40  ;;  %2977 = vmatprep.subr.bf16.mxu1 (!%p2694_p5), %v3127_v63 }
 0xf53   : > { %v2214_v13 = vadd.f32 0.2548296, %v2212_v12  ;;  %v2385_v12 = vld [vmem:[%s3523_s3 + $0x18] sm:$0xff] (!%p2694_p5) }
 0xf54   : > { %v2217_v9 = vmul.f32 %v3059_v59, %v2215_v46  ;;  %v3129_v46 = vmov (!%p2694_p5), 0.0  }
 0xf55   : > { %v2216_v14 = vmul.f32 %v3061_v61, %v2214_v13  ;;  %2928 = vmatprep.mubr.msk.f32.mxu1 (!%p2694_p5), %vm3128_vm9, %v3129_v46  ;;  %v2975_v13 = vpack.c.bf16 (!%p2694_p5), %v2385_v12, %v2384_v8 }
 0xf56   : > { %v2227_v16 = vmul.f32 %v3063_v11, %v2217_v9 }
 0xf57   : > { %v2226_v17 = vmul.f32 %v3065_v15, %v2216_v14  ;;  %v2468_v14 = vld [vmem:[%s3524_s4] sm:$0xff] (!%p2694_p5)  ;;  %v2469_v15 = vld [vmem:[%s3524_s4 + $0x8] sm:$0xff] (!%p2694_p5) }
 0xf58   : > { %v2229_v18 = vsub.f32 1.0, %v2227_v16  ;;  %v2470_v16 = vld [vmem:[%s3524_s4 + $0x10] sm:$0xff] (!%p2694_p5) }
 0xf59   : > { %v2228_v19 = vsub.f32 1.0, %v2226_v17  ;;  %v2978_v17 = vpack.c.bf16 (!%p2694_p5), %v2469_v15, %v2468_v14 }
 0xf5a   : > { %v2233_v20 = vsub.f32 0.0, %v2229_v18 }
 0xf5b   : > { %v2232_v47 = vsub.f32 0.0, %v2228_v19  ;;  %2979 = vmatpush3.bf16.msra.mxu1 (!%p2694_p5), %v2978_v17 }
 0xf5c   : > { %v2235_v23 = vsel %vm2231_vm6, %v2229_v18, %v2233_v20  ;;  %v2471_v18 = vld [vmem:[%s3524_s4 + $0x18] sm:$0xff] (!%p2694_p5)  ;;  %2980 = vmatprep.subr.bf16.mxu1 (!%p2694_p5), %v3127_v63  ;;  %v2695_v20 = vld [vmem:[%s3522_s2 + $0x2] ss:$0 sm:$0xff] (!%p2694_p5) }
 0xf5d   : > { %v2237_v24 = vadd.f32 1.0, %v2235_v23  ;;  %v2234_v25 = vsel %vm2230_vm7, %v2228_v19, %v2232_v47  ;;  %v2981_v19 = vpack.c.bf16 (!%p2694_p5), %v2471_v18, %v2470_v16 }
 0xf5e   : > { %v2236_v27 = vadd.f32 1.0, %v2234_v25 }
 0xf5f   : > { %v2239_v32 = vmul.f32 %v2237_v24, %v2187_v29  ;;  %2982 = vmatpush3.bf16.msra.mxu1 (!%p2694_p5), %v2981_v19 }
 0xf60   : > { %v2238_v31 = vmul.f32 %v2236_v27, %v2186_v26  ;;  %v2697_v26 = vld [vmem:[%s3522_s2 + $0x3] ss:$0 sm:$0xff] (!%p2694_p5) }
 0xf62   : > { %2906 = vmatprep.mubr.msk.f32.mxu0 %vm2252_vm8, %v2238_v31 }
 0xf63   : > { %2907 = vmatmul.mubr.msk.f32.vlgmr.msra.gmra.mrb[16].mxu0 %vm2252_vm8, %v2239_v32 }
 0xf64   : > { %2917 = vmatprep.mubr.msk.f32.mxu0 (!%p2694_p5), %vm3128_vm9, %v3129_v46  ;;  %2973 = vmatpush3.bf16.msra.mxu0 (!%p2694_p5), %v2972_v10 }
 0xf65   : > { %2974 = vmatprep.subr.bf16.mxu0 (!%p2694_p5), %v3127_v63 }
 0xf68   : > { %2976 = vmatpush3.bf16.msra.mxu0 (!%p2694_p5), %v2975_v13 }
0x1036   : > { %v2908_v36 = vpop.f32.mrb[16].mxu0 }
0x1037   : > { %v2331_v39 = vadd.f32 %v2908_v36, %v2251_v34  ;;  %v2325_v41 = vpop.f32.mrb[17].mxu0 }
0x1038   : > { %v2326_v43 = vadd.f32 %v2325_v41, %v2251_v34 }
0x1039   : > { %v2335_v44 = vadd.f32 %v2331_v39, %v3433_v22 }
0x103a   : > { %v2334_v48 = vadd.f32 %v2326_v43, %v3429_v21 }
0x103b   : > { %v2339_v49 = vsel %vm484_vm1, %v2335_v44, 0.0 }
0x103c   : > { %2340 = vadd.xlane.f32.xlu0 %v2339_v49  ;;  %v2336_v45 = vsel %vm484_vm1, %v2334_v48, 0.0 }
0x103d   : > { %2337 = vadd.xlane.f32.xlu1 %v2336_v45 }
0x10c9   : > { %v2341_v50 = vpop.xlane.xlu0 %2340 }
0x10ca   : > { %v2343_v51 = vmul.f32 0.03125, %v2341_v50  ;;  %v2338_v28 = vpop.xlane.xlu1 %2337 }
0x10cb   : > { %v2342_v52 = vmul.f32 0.03125, %v2338_v28 }
0x10cc   : > { %v2345_v53 = vsub.f32 %v2335_v44, %v2343_v51 }
0x10cd   : > { %v2344_v54 = vsub.f32 %v2334_v48, %v2342_v52 }
0x10ce   : > { %v2347_v55 = vmul.f32 %v2345_v53, %v2345_v53 }
0x10cf   : > { %v2346_v56 = vmul.f32 %v2344_v54, %v2344_v54 }
0x10d0   : > { %v2351_v58 = vsel %vm484_vm1, %v2347_v55, 0.0 }
0x10d1   : > { %2352 = vadd.xlane.f32.xlu0 %v2351_v58  ;;  %v2348_v22 = vsel %vm484_vm1, %v2346_v56, 0.0 }
0x10d2   : > { %2349 = vadd.xlane.f32.xlu1 %v2348_v22 }
0x115e   : > { %v2353_v21 = vpop.xlane.xlu0 %2352 }
0x115f   : > { %v2355_v30 = vmul.f32 0.03125, %v2353_v21  ;;  %v2350_v59 = vpop.xlane.xlu1 %2349 }
0x1160   : > { %v2354_v60 = vmul.f32 0.03125, %v2350_v59 }
0x1161   : > { %v2357_v61 = vadd.f32 1e-12, %v2355_v30 }
0x1162   : > { %v2356_v62 = vadd.f32 1e-12, %v2354_v60 }
0x1163   : > { %3066 = vrsqrt.f32 %v2357_v61 }
0x1164   : > { %3068 = vrsqrt.f32 %v2356_v62 }
0x116d   : > { %v3067_v37 = vpop.eup %3066 }
0x116e   : > { %v3069_v35 = vpop.eup %3068  ;;  %v2361_v4 = vmul.f32 %v3067_v37, %v2345_v53 }
0x116f   : > { %v2360_v5 = vmul.f32 %v3069_v35, %v2344_v54  ;;  %2379 = sbr.rel (%p2694_p5) target bundleno = 4911 (0x132f), region = 68 }
0x1170   : > { %v2367_v38 = vmul.f32 %v2365_v2, %v2361_v4 }
0x1171   : > { %v2366_v57 = vmul.f32 %v2365_v2, %v2360_v5 }
0x1172   : > { %v2373_v6 = vadd.f32 %v2371_v3, %v2367_v38 }
0x1173   : > { %v2372_v7 = vadd.f32 %v2371_v3, %v2366_v57 }
0x1174   : > { %2375 = vst.msk [vmem:[#allocation2 + $0x8] sm:$0xff] %vm484_vm1, %v2373_v6  ;;  %v2392_v9 = vrot.slane (!%p2694_p5), %v2373_v6, 7 }
0x1175   : > { %2374 = vst.msk [vmem:[#allocation2] sm:$0xff] %vm484_vm1, %v2372_v7 }
0x1176   : > { %v2394_v11 = vsel %vm2393_vm10, %v2392_v9, %v2372_v7 }
0x1177   : > { %2918 = vmatmul.mubr.msk.f32.vlgmr.msra.gmra.mrb[0].mxu0 %vm484_vm1, %v2394_v11 }
0x124a   : > { %v2463_v47 = vpop.f32.mrb[0].mxu0 }
0x124b   : > { %v2464_v23 = vadd.f32 %v2695_v20, %v2463_v47  ;;  %v2919_v24 = vpop.f32.mrb[1].mxu0 }
0x124d   : > { %3070 = vtanh.f32 %v2464_v23 }
0x1257   : > { %v3071_v25 = vpop.eup %3070 }
0x1258   : > { %2929 = vmatmul.mubr.msk.f32.vlgmr.msra.gmra.mrb[0].mxu1 %vm484_vm1, %v3071_v25 }
0x132b   : > { %v2545_v27 = vpop.f32.mrb[0].mxu1 }
0x132c   : > { %v2546_v29 = vadd.f32 %v2697_v26, %v2545_v27  ;;  %v2930_v31 = vpop.f32.mrb[1].mxu1 }
0x132e   : > { %2550 = vst.msk [vmem:[#allocation3] sm:$0x3] %vm2549_vm11, %v2546_v29 }
0x132f PF: > { %p2987_p6 = scmp.eq.s32.totalorder %s3192_s14, 1  ;;  %s3130_s29 = smov [#allocation3]  }
0x1330   : > { %s2558_s27 = sshll.u32 %s3130_s29, 4  ;;  %s2559_s27 = int_to_ptr.vmem [resolvable:$true] %s2558_s27 }
0x1331   : > { %s3072_s28 = scalar_lea.vmem %s2559_s27, 32  ;;  %p3079_p10 = scmp.lt.s32.totalorder %s2559_s27, %s2559_s27 }
0x1332   : > { %p3073_p7 = scmp.ne.s32.totalorder %s2559_s27, %s3072_s28  ;;  %p3080_p11 = scmp.lt.s32.totalorder %s3072_s28, %s3072_s28 }
0x1334   : > { %p3074_p8 = pnand %p3073_p7, %p2987_p6  ;;  %p3081_p12 = por %p3080_p11, %p3079_p10 }
0x1336   : > { %p3075_p9 = pneg %p3074_p8 }
0x1338   : > { %p3082_p13 = pnand %p3081_p12, %p3075_p9 }
0x133a   : > { %3085 = shalt.err (!%p3082_p13)
}
0x133b   : > { %s3086_s12 = scalar_lea.hbm %s3530_s10, 32 }
0x133c   : > { %p3087_p0 = scmp.ne.s32.totalorder %s3530_s10, %s3086_s12  ;;  %p3092_p3 = scmp.lt.u32.totalorder %s3086_s12, %s3530_s10 }
0x133e   : > { %p3088_p1 = pnand %p3087_p0, %p2987_p6 }
0x1340   : > { %p3089_p2 = pneg %p3088_p1 }
0x1342   : > { %p3094_p4 = pnand %p3092_p3, %p3089_p2 }
0x1344   : > { %3097 = shalt.err (!%p3094_p4)
}
0x1345   : > { %2984 = dma.vmem_to_hbm [thread:$0]  (%p2987_p6), %s2559_s27, 32, %s3530_s10, [#allocation4]  }
0x1346   : > { %3103 = dma.done.wait (%p2987_p6), [#allocation4], 32  }
0x1347   : > { %3105 = vsyncadd (%p2987_p6), [#allocation4], 4294967264 }
0x1348 PF: > { %s21_s13 = sadd.s32 1, %s3108_s13  }
0x1349   : > { %p18_p5 = scmp.ge.s32.totalorder %s21_s13, 4  }
0x134b   :  { %20 = sbr.rel (!%p18_p5) target bundleno = 1 (0x1), region = 107 }
0x1352   :  { %2571 = vsyncpa [#allocation4], 1 }
0x1353   :  { %2573 = vsyncpa [#allocation4 + $0x1], 1 }

</bundles_post_ra>
